<compile_context>
chip_gen: v6e
topology: v6e:2x2x1
jax: 0.10.0
libtpu: 0.0.40
codegen_flags: <defaults>
</compile_context>

<pallas_src>
import functools

import numpy as np

import jax
import jax.numpy as jnp
from jax.experimental import pallas as pl
from jax.experimental.pallas import tpu as pltpu


# ---------------------------------------------------------------------------
# Fused forward kernel (one grid step == one batch tile of `bt` images)
# ---------------------------------------------------------------------------
def _fused_cnn_kernel(x_ref, s1_ref, bb1_ref, s2_ref, bb2_ref,
                      w1k_ref, lb1_ref, w2_ref, lb2_ref, o_ref):
    f32 = jnp.float32
    bt = x_ref.shape[0]

    def shift_lanes(v):
        # v2[:, l] = v[:, l + 1] (last lane duplicated). max(v, v2) at even lane
        # 2k == max(v[2k], v[2k+1]) -> the `ow`-direction of a 2x2 max-pool.
        return jnp.concatenate([v[:, 1:], v[:, -1:]], axis=1)

    # ---- conv1 (1->10, 5x5, valid) as 5 banded matmuls ----------------------
    # rows = (image, oh) = bt*24 ; lanes = (c1, ow) = 10*24 = 240 (lane-dense)
    acc1 = jnp.zeros((bt * 24, 240), f32)
    for i in range(5):
        xi = x_ref[:, pl.ds(i, 24), :].reshape(bt * 24, 28)
        acc1 = acc1 + jnp.dot(xi, s1_ref[i], preferred_element_type=f32)
    acc1 = acc1 + bb1_ref[...]                       # conv1 bias (per channel)

    # ---- maxpool1 (2x2): lane direction here, row direction fused into the
    #      conv2 row reads below. Valid pooled values sit at even lanes.
    a2 = jnp.maximum(acc1, shift_lanes(acc1)).reshape(bt, 24, 240)
    a2 = jnp.concatenate([a2, a2[:, 23:24, :]], axis=1)   # pad to 25 rows/img

    # ---- conv2 (10->20, 5x5) as 5 banded matmuls over pooled+ReLU'd input ---
    # rows = (image, r2) = bt*16 (even r2 are the valid oh2) ; lanes = (c2, ow2) = 160
    acc2 = jnp.zeros((bt * 16, 160), f32)
    for i in range(5):
        ra = a2[:, 2 * i:2 * i + 16, :]
        rb = a2[:, 2 * i + 1:2 * i + 17, :]
        xi = jnp.maximum(jnp.maximum(ra, rb), 0.0)        # pool1 row-pairs + ReLU
        xi = xi.reshape(bt * 16, 240)
        acc2 = acc2 + jnp.dot(xi, s2_ref[i], preferred_element_type=f32)
    acc2 = acc2 + bb2_ref[...]                       # conv2 bias (per channel)
    # TODO(synk): nn.Dropout2d is identity in eval mode; training-mode channel
    # dropout would use pltpu.prng_* here.

    # ---- maxpool2 (2x2): lane direction; row direction folded into linear1 --
    a3 = jnp.maximum(acc2, shift_lanes(acc2)).reshape(bt, 16, 160)

    # ---- flatten(320) + linear1 + ReLU --------------------------------------
    # torch's reshape(-1, 320) feature permutation is folded into w1k.
    acc3 = jnp.zeros((bt, 50), f32)
    for k in range(4):
        hk = jnp.maximum(jnp.maximum(a3[:, 4 * k, :], a3[:, 4 * k + 2, :]), 0.0)
        acc3 = acc3 + jnp.dot(hk, w1k_ref[k], preferred_element_type=f32)
    h = jnp.maximum(acc3 + lb1_ref[...], 0.0)
    # TODO(synk): F.dropout(x, p) is identity for p = 0.0 / eval; stochastic
    # dropout omitted.

    # ---- linear2 + log_softmax ----------------------------------------------
    logits = jnp.dot(h, w2_ref[...], preferred_element_type=f32) + lb2_ref[...]
    m = jnp.max(logits, axis=1, keepdims=True)
    s = logits - m
    lse = jnp.log(jnp.sum(jnp.exp(s), axis=1, keepdims=True))
    o_ref[...] = (s - lse).astype(o_ref.dtype)


# ---------------------------------------------------------------------------
# Wrapper-side weight preparation (banded conv matrices, folded linear1)
# ---------------------------------------------------------------------------
def _prepare_weights(params):
    w1 = params["conv1_w"].astype(jnp.float32)   # (10, 1, 5, 5)
    b1 = params["conv1_b"].astype(jnp.float32)   # (10,)
    w2 = params["conv2_w"].astype(jnp.float32)   # (20, 10, 5, 5)
    b2 = params["conv2_b"].astype(jnp.float32)   # (20,)
    l1w = params["lin1_w"].astype(jnp.float32)   # (50, 320)  torch (out, in)
    l1b = params["lin1_b"].astype(jnp.float32)   # (50,)
    l2w = params["lin2_w"].astype(jnp.float32)   # (10, 50)
    l2b = params["lin2_b"].astype(jnp.float32)   # (10,)

    # conv1 banded: S1[i, w_in, c*24 + ow] = w1[c, 0, i, w_in - ow], 0<=w_in-ow<5
    i_, c_, ow_, j_ = np.meshgrid(np.arange(5), np.arange(10), np.arange(24),
                                  np.arange(5), indexing="ij")
    s1 = jnp.zeros((5, 28, 240), jnp.float32)
    s1 = s1.at[i_, ow_ + j_, c_ * 24 + ow_].set(w1[:, 0][c_, i_, j_])

    # conv2 banded over the (lane-pooled, un-compacted) input layout:
    # S2[i, c1*24 + 2*(ow2 + j), c2*8 + ow2] = w2[c2, c1, i, j]
    i_, c2_, ow2_, c1_, j_ = np.meshgrid(np.arange(5), np.arange(20),
                                         np.arange(8), np.arange(10),
                                         np.arange(5), indexing="ij")
    s2 = jnp.zeros((5, 240, 160), jnp.float32)
    s2 = s2.at[i_, c1_ * 24 + 2 * (ow2_ + j_), c2_ * 8 + ow2_].set(
        w2[c2_, c1_, i_, j_])

    # linear1 with torch flatten order (c2, q, t) folded in:
    # W1K[k, c2*8 + 2*t, n] = l1w[n, c2*16 + k*4 + t]
    k_, c2_, t_, n_ = np.meshgrid(np.arange(4), np.arange(20), np.arange(4),
                                  np.arange(50), indexing="ij")
    w1k = jnp.zeros((4, 160, 50), jnp.float32)
    w1k = w1k.at[k_, c2_ * 8 + 2 * t_, n_].set(l1w[n_, c2_ * 16 + k_ * 4 + t_])

    bb1 = jnp.repeat(b1, 24).reshape(1, 240)     # lane c*24+ow  -> b1[c]
    bb2 = jnp.repeat(b2, 8).reshape(1, 160)      # lane c2*8+ow2 -> b2[c2]
    lb1 = l1b.reshape(1, 50)
    w2l = l2w.T                                  # (50, 10), pre-transposed
    lb2 = l2b.reshape(1, 10)
    return s1, bb1, s2, bb2, w1k, lb1, w2l, lb2


# ---------------------------------------------------------------------------
# Forward
# ---------------------------------------------------------------------------
def cnn_forward(params, x, *, block_b=8):
    B = x.shape[0]
    assert x.shape[1:] == (1, 28, 28), x.shape
    xs = x.reshape(B, 28, 28).astype(jnp.float32)

    bt = min(block_b, B)
    bp = ((B + bt - 1) // bt) * bt
    if bp != B:
        xs = jnp.concatenate(
            [xs, jnp.zeros((bp - B, 28, 28), jnp.float32)], axis=0)

    s1, bb1, s2, bb2, w1k, lb1, w2l, lb2 = _prepare_weights(params)
    grid = (bp // bt,)

    def resident(shape):
        nd = len(shape)
        return pl.BlockSpec(shape, lambda b, _nd=nd: (0,) * _nd)

    flops = int(grid[0] * (2 * 5 * (bt * 24) * 28 * 240
                           + 2 * 5 * (bt * 16) * 240 * 160
                           + 2 * 4 * bt * 160 * 50
                           + 2 * bt * 50 * 10))
    bytes_accessed = int(xs.size * 4 + bp * 10 * 4
                         + (s1.size + bb1.size + s2.size + bb2.size
                            + w1k.size + lb1.size + w2l.size + lb2.size) * 4)

    out = pl.pallas_call(
        _fused_cnn_kernel,
        out_shape=jax.ShapeDtypeStruct((bp, 10), jnp.float32),
        grid=grid,
        in_specs=[
            pl.BlockSpec((bt, 28, 28), lambda b: (b, 0, 0)),
            resident(s1.shape), resident(bb1.shape),
            resident(s2.shape), resident(bb2.shape),
            resident(w1k.shape), resident(lb1.shape),
            resident(w2l.shape), resident(lb2.shape),
        ],
        out_specs=pl.BlockSpec((bt, 10), lambda b: (b, 0)),
        compiler_params=pltpu.CompilerParams(
            dimension_semantics=("parallel",),
            vmem_limit_bytes=32 * 1024 * 1024,
        ),
        cost_estimate=pl.CostEstimate(flops=flops,
                                      transcendentals=int(bp * 10),
                                      bytes_accessed=bytes_accessed),
    )(xs, s1, bb1, s2, bb2, w1k, lb1, w2l, lb2)
    return out[:B]


# ---------------------------------------------------------------------------
# Deterministic PyTorch-shaped parameters + pure-JAX reference (for checking)
# ---------------------------------------------------------------------------
def init_params(key):
    def uniform(key, shape, fan_in):
        bound = 1.0 / jnp.sqrt(float(fan_in))
        return jax.random.uniform(key, shape, jnp.float32, -bound, bound)

    ks = jax.random.split(key, 8)
    return {
        "conv1_w": uniform(ks[0], (10, 1, 5, 5), 1 * 5 * 5),
        "conv1_b": uniform(ks[1], (10,), 1 * 5 * 5),
        "conv2_w": uniform(ks[2], (20, 10, 5, 5), 10 * 5 * 5),
        "conv2_b": uniform(ks[3], (20,), 10 * 5 * 5),
        "lin1_w": uniform(ks[4], (50, 320), 320),   # torch Linear: (out, in)
        "lin1_b": uniform(ks[5], (50,), 320),
        "lin2_w": uniform(ks[6], (10, 50), 50),
        "lin2_b": uniform(ks[7], (10,), 50),
    }


def _reference_forward(params, x):
    hi = jax.lax.Precision.HIGHEST

    def conv(x, w, b):
        B, C, H, W = x.shape
        O = w.shape[0]
        OH, OW = H - 4, W - 4
        y = jnp.zeros((B, O, OH, OW), jnp.float32) + b.reshape(1, O, 1, 1)
        for i in range(5):
            for j in range(5):
                patch = x[:, :, i:i + OH, j:j + OW]
                y = y + jnp.einsum("bchw,oc->bohw", patch, w[:, :, i, j],
                                   precision=hi)
        return y

    def pool_relu(x):
        m = jnp.maximum(jnp.maximum(x[:, :, 0::2, 0::2], x[:, :, 0::2, 1::2]),
                        jnp.maximum(x[:, :, 1::2, 0::2], x[:, :, 1::2, 1::2]))
        return jnp.maximum(m, 0.0)

    x = pool_relu(conv(x, params["conv1_w"], params["conv1_b"]))
    x = pool_relu(conv(x, params["conv2_w"], params["conv2_b"]))
    x = x.reshape(-1, 320)
    x = jnp.maximum(jnp.dot(x, params["lin1_w"].T, precision=hi)
                    + params["lin1_b"], 0.0)
    logits = jnp.dot(x, params["lin2_w"].T, precision=hi) + params["lin2_b"]
    return jax.nn.log_softmax(logits, axis=1)


if __name__ == "__main__":
    key = jax.random.PRNGKey(0)
    pkey, xkey = jax.random.split(key)
    params = init_params(pkey)
    # MNIST-style input: the 320-feature flatten implies 28x28 single-channel.
    x = jax.random.normal(xkey, (2, 1, 28, 28), jnp.float32)

    out = jax.block_until_ready(jax.jit(cnn_forward)(params, x))

    assert out.shape == (2, 10) and out.dtype == jnp.float32
    # log_softmax rows must (numerically) sum to 1 after exp.
    assert bool(jnp.allclose(jnp.sum(jnp.exp(out), axis=1), 1.0, atol=1e-4))

    ref = jax.block_until_ready(jax.jit(_reference_forward)(params, x))
    assert bool(jnp.allclose(out, ref, atol=5e-3, rtol=5e-3)), (
        "max abs diff vs reference: %e" % float(jnp.max(jnp.abs(out - ref))))

    print("KERNEL_OK")
</pallas_src>

<mosaic_0001>
module attributes {stable_mosaic.version = 11 : i64} {
  func.func @_fused_cnn_kernel(%arg0: i32, %arg1: memref<2x28x28xf32, #tpu.memory_space<vmem>>, %arg2: memref<5x28x240xf32, #tpu.memory_space<vmem>>, %arg3: memref<1x240xf32, #tpu.memory_space<vmem>>, %arg4: memref<5x240x160xf32, #tpu.memory_space<vmem>>, %arg5: memref<1x160xf32, #tpu.memory_space<vmem>>, %arg6: memref<4x160x50xf32, #tpu.memory_space<vmem>>, %arg7: memref<1x50xf32, #tpu.memory_space<vmem>>, %arg8: memref<50x10xf32, #tpu.memory_space<vmem>>, %arg9: memref<1x10xf32, #tpu.memory_space<vmem>>, %arg10: memref<2x10xf32, #tpu.memory_space<vmem>>) attributes {dimension_semantics = [#tpu.dimension_semantics<parallel>], iteration_bounds = array<i64: 1>, scalar_prefetch = 0 : i64, scratch_operands = 0 : i64, tpu.core_type = #tpu.core_type<tc>, window_params = [{transform_indices = @transform_0, window_bounds = array<i64: 2, 28, 28>}, {pipeline_mode = #tpu.pipeline_mode<synchronous>, transform_indices = @transform_1, window_bounds = array<i64: 5, 28, 240>}, {pipeline_mode = #tpu.pipeline_mode<synchronous>, transform_indices = @transform_2, window_bounds = array<i64: 1, 240>}, {pipeline_mode = #tpu.pipeline_mode<synchronous>, transform_indices = @transform_3, window_bounds = array<i64: 5, 240, 160>}, {pipeline_mode = #tpu.pipeline_mode<synchronous>, transform_indices = @transform_4, window_bounds = array<i64: 1, 160>}, {pipeline_mode = #tpu.pipeline_mode<synchronous>, transform_indices = @transform_5, window_bounds = array<i64: 4, 160, 50>}, {pipeline_mode = #tpu.pipeline_mode<synchronous>, transform_indices = @transform_6, window_bounds = array<i64: 1, 50>}, {pipeline_mode = #tpu.pipeline_mode<synchronous>, transform_indices = @transform_7, window_bounds = array<i64: 50, 10>}, {pipeline_mode = #tpu.pipeline_mode<synchronous>, transform_indices = @transform_8, window_bounds = array<i64: 1, 10>}, {transform_indices = @transform_9, window_bounds = array<i64: 2, 10>}]} {
    %cst = arith.constant 0.000000e+00 : f32
    %0 = vector.broadcast %cst : f32 to vector<48x240xf32>
    %c0 = arith.constant 0 : index
    %c0_0 = arith.constant 0 : index
    %c0_1 = arith.constant 0 : index
    %1 = vector.load %arg1[%c0, %c0_0, %c0_1] : memref<2x28x28xf32, #tpu.memory_space<vmem>>, vector<2x24x28xf32>
    %2 = vector.shape_cast %1 : vector<2x24x28xf32> to vector<48x28xf32>
    %c0_2 = arith.constant 0 : index
    %c0_3 = arith.constant 0 : index
    %c0_4 = arith.constant 0 : index
    %3 = vector.load %arg2[%c0_2, %c0_3, %c0_4] : memref<5x28x240xf32, #tpu.memory_space<vmem>>, vector<1x28x240xf32>
    %4 = vector.shape_cast %3 : vector<1x28x240xf32> to vector<28x240xf32>
    %cst_5 = arith.constant dense<0.000000e+00> : vector<48x240xf32>
    %5 = tpu.matmul %2, %4, %cst_5 {dimension_numbers = #tpu.dot_dimension_numbers<[1], [0], [0], [1], [0, 0, 1, 1], [], []>} : vector<48x28xf32>, vector<28x240xf32>, vector<48x240xf32> -> vector<48x240xf32>
    %6 = arith.addf %0, %5 : vector<48x240xf32>
    %c0_6 = arith.constant 0 : index
    %c1 = arith.constant 1 : index
    %c0_7 = arith.constant 0 : index
    %7 = vector.load %arg1[%c0_6, %c1, %c0_7] : memref<2x28x28xf32, #tpu.memory_space<vmem>>, vector<2x24x28xf32>
    %8 = vector.shape_cast %7 : vector<2x24x28xf32> to vector<48x28xf32>
    %c1_8 = arith.constant 1 : index
    %c0_9 = arith.constant 0 : index
    %c0_10 = arith.constant 0 : index
    %9 = vector.load %arg2[%c1_8, %c0_9, %c0_10] : memref<5x28x240xf32, #tpu.memory_space<vmem>>, vector<1x28x240xf32>
    %10 = vector.shape_cast %9 : vector<1x28x240xf32> to vector<28x240xf32>
    %cst_11 = arith.constant dense<0.000000e+00> : vector<48x240xf32>
    %11 = tpu.matmul %8, %10, %cst_11 {dimension_numbers = #tpu.dot_dimension_numbers<[1], [0], [0], [1], [0, 0, 1, 1], [], []>} : vector<48x28xf32>, vector<28x240xf32>, vector<48x240xf32> -> vector<48x240xf32>
    %12 = arith.addf %6, %11 : vector<48x240xf32>
    %c0_12 = arith.constant 0 : index
    %c2 = arith.constant 2 : index
    %c0_13 = arith.constant 0 : index
    %13 = vector.load %arg1[%c0_12, %c2, %c0_13] : memref<2x28x28xf32, #tpu.memory_space<vmem>>, vector<2x24x28xf32>
    %14 = vector.shape_cast %13 : vector<2x24x28xf32> to vector<48x28xf32>
    %c2_14 = arith.constant 2 : index
    %c0_15 = arith.constant 0 : index
    %c0_16 = arith.constant 0 : index
    %15 = vector.load %arg2[%c2_14, %c0_15, %c0_16] : memref<5x28x240xf32, #tpu.memory_space<vmem>>, vector<1x28x240xf32>
    %16 = vector.shape_cast %15 : vector<1x28x240xf32> to vector<28x240xf32>
    %cst_17 = arith.constant dense<0.000000e+00> : vector<48x240xf32>
    %17 = tpu.matmul %14, %16, %cst_17 {dimension_numbers = #tpu.dot_dimension_numbers<[1], [0], [0], [1], [0, 0, 1, 1], [], []>} : vector<48x28xf32>, vector<28x240xf32>, vector<48x240xf32> -> vector<48x240xf32>
    %18 = arith.addf %12, %17 : vector<48x240xf32>
    %c0_18 = arith.constant 0 : index
    %c3 = arith.constant 3 : index
    %c0_19 = arith.constant 0 : index
    %19 = vector.load %arg1[%c0_18, %c3, %c0_19] : memref<2x28x28xf32, #tpu.memory_space<vmem>>, vector<2x24x28xf32>
    %20 = vector.shape_cast %19 : vector<2x24x28xf32> to vector<48x28xf32>
    %c3_20 = arith.constant 3 : index
    %c0_21 = arith.constant 0 : index
    %c0_22 = arith.constant 0 : index
    %21 = vector.load %arg2[%c3_20, %c0_21, %c0_22] : memref<5x28x240xf32, #tpu.memory_space<vmem>>, vector<1x28x240xf32>
    %22 = vector.shape_cast %21 : vector<1x28x240xf32> to vector<28x240xf32>
    %cst_23 = arith.constant dense<0.000000e+00> : vector<48x240xf32>
    %23 = tpu.matmul %20, %22, %cst_23 {dimension_numbers = #tpu.dot_dimension_numbers<[1], [0], [0], [1], [0, 0, 1, 1], [], []>} : vector<48x28xf32>, vector<28x240xf32>, vector<48x240xf32> -> vector<48x240xf32>
    %24 = arith.addf %18, %23 : vector<48x240xf32>
    %c0_24 = arith.constant 0 : index
    %c4 = arith.constant 4 : index
    %c0_25 = arith.constant 0 : index
    %25 = vector.load %arg1[%c0_24, %c4, %c0_25] : memref<2x28x28xf32, #tpu.memory_space<vmem>>, vector<2x24x28xf32>
    %26 = vector.shape_cast %25 : vector<2x24x28xf32> to vector<48x28xf32>
    %c4_26 = arith.constant 4 : index
    %c0_27 = arith.constant 0 : index
    %c0_28 = arith.constant 0 : index
    %27 = vector.load %arg2[%c4_26, %c0_27, %c0_28] : memref<5x28x240xf32, #tpu.memory_space<vmem>>, vector<1x28x240xf32>
    %28 = vector.shape_cast %27 : vector<1x28x240xf32> to vector<28x240xf32>
    %cst_29 = arith.constant dense<0.000000e+00> : vector<48x240xf32>
    %29 = tpu.matmul %26, %28, %cst_29 {dimension_numbers = #tpu.dot_dimension_numbers<[1], [0], [0], [1], [0, 0, 1, 1], [], []>} : vector<48x28xf32>, vector<28x240xf32>, vector<48x240xf32> -> vector<48x240xf32>
    %30 = arith.addf %24, %29 : vector<48x240xf32>
    %c0_30 = arith.constant 0 : index
    %c0_31 = arith.constant 0 : index
    %31 = vector.load %arg3[%c0_30, %c0_31] : memref<1x240xf32, #tpu.memory_space<vmem>>, vector<1x240xf32>
    %32 = vector.broadcast %31 : vector<1x240xf32> to vector<48x240xf32>
    %33 = arith.addf %30, %32 : vector<48x240xf32>
    %34 = vector.extract_strided_slice %33 {offsets = [0, 1], sizes = [48, 239], strides = [1, 1]} : vector<48x240xf32> to vector<48x239xf32>
    %35 = vector.extract_strided_slice %33 {offsets = [0, 239], sizes = [48, 1], strides = [1, 1]} : vector<48x240xf32> to vector<48x1xf32>
    %36 = tpu.concatenate %34, %35 in 1 : vector<48x239xf32>, vector<48x1xf32> -> vector<48x240xf32>
    %37 = arith.maximumf %33, %36 : vector<48x240xf32>
    %38 = vector.shape_cast %37 : vector<48x240xf32> to vector<2x24x240xf32>
    %39 = vector.extract_strided_slice %38 {offsets = [0, 23, 0], sizes = [2, 1, 240], strides = [1, 1, 1]} : vector<2x24x240xf32> to vector<2x1x240xf32>
    %40 = tpu.concatenate %38, %39 in 1 : vector<2x24x240xf32>, vector<2x1x240xf32> -> vector<2x25x240xf32>
    %cst_32 = arith.constant 0.000000e+00 : f32
    %41 = vector.broadcast %cst_32 : f32 to vector<32x160xf32>
    %42 = vector.extract_strided_slice %40 {offsets = [0, 0, 0], sizes = [2, 16, 240], strides = [1, 1, 1]} : vector<2x25x240xf32> to vector<2x16x240xf32>
    %43 = vector.extract_strided_slice %40 {offsets = [0, 1, 0], sizes = [2, 16, 240], strides = [1, 1, 1]} : vector<2x25x240xf32> to vector<2x16x240xf32>
    %44 = arith.maximumf %42, %43 : vector<2x16x240xf32>
    %cst_33 = arith.constant 0.000000e+00 : f32
    %45 = vector.broadcast %cst_33 : f32 to vector<2x16x240xf32>
    %46 = arith.maximumf %44, %45 : vector<2x16x240xf32>
    %47 = vector.shape_cast %46 : vector<2x16x240xf32> to vector<32x240xf32>
    %c0_34 = arith.constant 0 : index
    %c0_35 = arith.constant 0 : index
    %c0_36 = arith.constant 0 : index
    %48 = vector.load %arg4[%c0_34, %c0_35, %c0_36] : memref<5x240x160xf32, #tpu.memory_space<vmem>>, vector<1x240x160xf32>
    %49 = vector.shape_cast %48 : vector<1x240x160xf32> to vector<240x160xf32>
    %cst_37 = arith.constant dense<0.000000e+00> : vector<32x160xf32>
    %50 = tpu.matmul %47, %49, %cst_37 {dimension_numbers = #tpu.dot_dimension_numbers<[1], [0], [0], [1], [0, 0, 1, 1], [], []>} : vector<32x240xf32>, vector<240x160xf32>, vector<32x160xf32> -> vector<32x160xf32>
    %51 = arith.addf %41, %50 : vector<32x160xf32>
    %52 = vector.extract_strided_slice %40 {offsets = [0, 2, 0], sizes = [2, 16, 240], strides = [1, 1, 1]} : vector<2x25x240xf32> to vector<2x16x240xf32>
    %53 = vector.extract_strided_slice %40 {offsets = [0, 3, 0], sizes = [2, 16, 240], strides = [1, 1, 1]} : vector<2x25x240xf32> to vector<2x16x240xf32>
    %54 = arith.maximumf %52, %53 : vector<2x16x240xf32>
    %cst_38 = arith.constant 0.000000e+00 : f32
    %55 = vector.broadcast %cst_38 : f32 to vector<2x16x240xf32>
    %56 = arith.maximumf %54, %55 : vector<2x16x240xf32>
    %57 = vector.shape_cast %56 : vector<2x16x240xf32> to vector<32x240xf32>
    %c1_39 = arith.constant 1 : index
    %c0_40 = arith.constant 0 : index
    %c0_41 = arith.constant 0 : index
    %58 = vector.load %arg4[%c1_39, %c0_40, %c0_41] : memref<5x240x160xf32, #tpu.memory_space<vmem>>, vector<1x240x160xf32>
    %59 = vector.shape_cast %58 : vector<1x240x160xf32> to vector<240x160xf32>
    %cst_42 = arith.constant dense<0.000000e+00> : vector<32x160xf32>
    %60 = tpu.matmul %57, %59, %cst_42 {dimension_numbers = #tpu.dot_dimension_numbers<[1], [0], [0], [1], [0, 0, 1, 1], [], []>} : vector<32x240xf32>, vector<240x160xf32>, vector<32x160xf32> -> vector<32x160xf32>
    %61 = arith.addf %51, %60 : vector<32x160xf32>
    %62 = vector.extract_strided_slice %40 {offsets = [0, 4, 0], sizes = [2, 16, 240], strides = [1, 1, 1]} : vector<2x25x240xf32> to vector<2x16x240xf32>
    %63 = vector.extract_strided_slice %40 {offsets = [0, 5, 0], sizes = [2, 16, 240], strides = [1, 1, 1]} : vector<2x25x240xf32> to vector<2x16x240xf32>
    %64 = arith.maximumf %62, %63 : vector<2x16x240xf32>
    %cst_43 = arith.constant 0.000000e+00 : f32
    %65 = vector.broadcast %cst_43 : f32 to vector<2x16x240xf32>
    %66 = arith.maximumf %64, %65 : vector<2x16x240xf32>
    %67 = vector.shape_cast %66 : vector<2x16x240xf32> to vector<32x240xf32>
    %c2_44 = arith.constant 2 : index
    %c0_45 = arith.constant 0 : index
    %c0_46 = arith.constant 0 : index
    %68 = vector.load %arg4[%c2_44, %c0_45, %c0_46] : memref<5x240x160xf32, #tpu.memory_space<vmem>>, vector<1x240x160xf32>
    %69 = vector.shape_cast %68 : vector<1x240x160xf32> to vector<240x160xf32>
    %cst_47 = arith.constant dense<0.000000e+00> : vector<32x160xf32>
    %70 = tpu.matmul %67, %69, %cst_47 {dimension_numbers = #tpu.dot_dimension_numbers<[1], [0], [0], [1], [0, 0, 1, 1], [], []>} : vector<32x240xf32>, vector<240x160xf32>, vector<32x160xf32> -> vector<32x160xf32>
    %71 = arith.addf %61, %70 : vector<32x160xf32>
    %72 = vector.extract_strided_slice %40 {offsets = [0, 6, 0], sizes = [2, 16, 240], strides = [1, 1, 1]} : vector<2x25x240xf32> to vector<2x16x240xf32>
    %73 = vector.extract_strided_slice %40 {offsets = [0, 7, 0], sizes = [2, 16, 240], strides = [1, 1, 1]} : vector<2x25x240xf32> to vector<2x16x240xf32>
    %74 = arith.maximumf %72, %73 : vector<2x16x240xf32>
    %cst_48 = arith.constant 0.000000e+00 : f32
    %75 = vector.broadcast %cst_48 : f32 to vector<2x16x240xf32>
    %76 = arith.maximumf %74, %75 : vector<2x16x240xf32>
    %77 = vector.shape_cast %76 : vector<2x16x240xf32> to vector<32x240xf32>
    %c3_49 = arith.constant 3 : index
    %c0_50 = arith.constant 0 : index
    %c0_51 = arith.constant 0 : index
    %78 = vector.load %arg4[%c3_49, %c0_50, %c0_51] : memref<5x240x160xf32, #tpu.memory_space<vmem>>, vector<1x240x160xf32>
    %79 = vector.shape_cast %78 : vector<1x240x160xf32> to vector<240x160xf32>
    %cst_52 = arith.constant dense<0.000000e+00> : vector<32x160xf32>
    %80 = tpu.matmul %77, %79, %cst_52 {dimension_numbers = #tpu.dot_dimension_numbers<[1], [0], [0], [1], [0, 0, 1, 1], [], []>} : vector<32x240xf32>, vector<240x160xf32>, vector<32x160xf32> -> vector<32x160xf32>
    %81 = arith.addf %71, %80 : vector<32x160xf32>
    %82 = vector.extract_strided_slice %40 {offsets = [0, 8, 0], sizes = [2, 16, 240], strides = [1, 1, 1]} : vector<2x25x240xf32> to vector<2x16x240xf32>
    %83 = vector.extract_strided_slice %40 {offsets = [0, 9, 0], sizes = [2, 16, 240], strides = [1, 1, 1]} : vector<2x25x240xf32> to vector<2x16x240xf32>
    %84 = arith.maximumf %82, %83 : vector<2x16x240xf32>
    %cst_53 = arith.constant 0.000000e+00 : f32
    %85 = vector.broadcast %cst_53 : f32 to vector<2x16x240xf32>
    %86 = arith.maximumf %84, %85 : vector<2x16x240xf32>
    %87 = vector.shape_cast %86 : vector<2x16x240xf32> to vector<32x240xf32>
    %c4_54 = arith.constant 4 : index
    %c0_55 = arith.constant 0 : index
    %c0_56 = arith.constant 0 : index
    %88 = vector.load %arg4[%c4_54, %c0_55, %c0_56] : memref<5x240x160xf32, #tpu.memory_space<vmem>>, vector<1x240x160xf32>
    %89 = vector.shape_cast %88 : vector<1x240x160xf32> to vector<240x160xf32>
    %cst_57 = arith.constant dense<0.000000e+00> : vector<32x160xf32>
    %90 = tpu.matmul %87, %89, %cst_57 {dimension_numbers = #tpu.dot_dimension_numbers<[1], [0], [0], [1], [0, 0, 1, 1], [], []>} : vector<32x240xf32>, vector<240x160xf32>, vector<32x160xf32> -> vector<32x160xf32>
    %91 = arith.addf %81, %90 : vector<32x160xf32>
    %c0_58 = arith.constant 0 : index
    %c0_59 = arith.constant 0 : index
    %92 = vector.load %arg5[%c0_58, %c0_59] : memref<1x160xf32, #tpu.memory_space<vmem>>, vector<1x160xf32>
    %93 = vector.broadcast %92 : vector<1x160xf32> to vector<32x160xf32>
    %94 = arith.addf %91, %93 : vector<32x160xf32>
    %95 = vector.extract_strided_slice %94 {offsets = [0, 1], sizes = [32, 159], strides = [1, 1]} : vector<32x160xf32> to vector<32x159xf32>
    %96 = vector.extract_strided_slice %94 {offsets = [0, 159], sizes = [32, 1], strides = [1, 1]} : vector<32x160xf32> to vector<32x1xf32>
    %97 = tpu.concatenate %95, %96 in 1 : vector<32x159xf32>, vector<32x1xf32> -> vector<32x160xf32>
    %98 = arith.maximumf %94, %97 : vector<32x160xf32>
    %99 = vector.shape_cast %98 : vector<32x160xf32> to vector<2x16x160xf32>
    %cst_60 = arith.constant 0.000000e+00 : f32
    %100 = vector.broadcast %cst_60 : f32 to vector<2x50xf32>
    %101 = vector.extract_strided_slice %99 {offsets = [0, 0, 0], sizes = [2, 1, 160], strides = [1, 1, 1]} : vector<2x16x160xf32> to vector<2x1x160xf32>
    %102 = vector.shape_cast %101 : vector<2x1x160xf32> to vector<2x160xf32>
    %103 = vector.extract_strided_slice %99 {offsets = [0, 2, 0], sizes = [2, 1, 160], strides = [1, 1, 1]} : vector<2x16x160xf32> to vector<2x1x160xf32>
    %104 = vector.shape_cast %103 : vector<2x1x160xf32> to vector<2x160xf32>
    %105 = arith.maximumf %102, %104 : vector<2x160xf32>
    %cst_61 = arith.constant 0.000000e+00 : f32
    %106 = vector.broadcast %cst_61 : f32 to vector<2x160xf32>
    %107 = arith.maximumf %105, %106 : vector<2x160xf32>
    %c0_62 = arith.constant 0 : index
    %c0_63 = arith.constant 0 : index
    %c0_64 = arith.constant 0 : index
    %108 = vector.load %arg6[%c0_62, %c0_63, %c0_64] : memref<4x160x50xf32, #tpu.memory_space<vmem>>, vector<1x160x50xf32>
    %109 = vector.shape_cast %108 : vector<1x160x50xf32> to vector<160x50xf32>
    %cst_65 = arith.constant dense<0.000000e+00> : vector<2x50xf32>
    %110 = tpu.matmul %107, %109, %cst_65 {dimension_numbers = #tpu.dot_dimension_numbers<[1], [0], [0], [1], [0, 0, 1, 1], [], []>} : vector<2x160xf32>, vector<160x50xf32>, vector<2x50xf32> -> vector<2x50xf32>
    %111 = arith.addf %100, %110 : vector<2x50xf32>
    %112 = vector.extract_strided_slice %99 {offsets = [0, 4, 0], sizes = [2, 1, 160], strides = [1, 1, 1]} : vector<2x16x160xf32> to vector<2x1x160xf32>
    %113 = vector.shape_cast %112 : vector<2x1x160xf32> to vector<2x160xf32>
    %114 = vector.extract_strided_slice %99 {offsets = [0, 6, 0], sizes = [2, 1, 160], strides = [1, 1, 1]} : vector<2x16x160xf32> to vector<2x1x160xf32>
    %115 = vector.shape_cast %114 : vector<2x1x160xf32> to vector<2x160xf32>
    %116 = arith.maximumf %113, %115 : vector<2x160xf32>
    %cst_66 = arith.constant 0.000000e+00 : f32
    %117 = vector.broadcast %cst_66 : f32 to vector<2x160xf32>
    %118 = arith.maximumf %116, %117 : vector<2x160xf32>
    %c1_67 = arith.constant 1 : index
    %c0_68 = arith.constant 0 : index
    %c0_69 = arith.constant 0 : index
    %119 = vector.load %arg6[%c1_67, %c0_68, %c0_69] : memref<4x160x50xf32, #tpu.memory_space<vmem>>, vector<1x160x50xf32>
    %120 = vector.shape_cast %119 : vector<1x160x50xf32> to vector<160x50xf32>
    %cst_70 = arith.constant dense<0.000000e+00> : vector<2x50xf32>
    %121 = tpu.matmul %118, %120, %cst_70 {dimension_numbers = #tpu.dot_dimension_numbers<[1], [0], [0], [1], [0, 0, 1, 1], [], []>} : vector<2x160xf32>, vector<160x50xf32>, vector<2x50xf32> -> vector<2x50xf32>
    %122 = arith.addf %111, %121 : vector<2x50xf32>
    %123 = vector.extract_strided_slice %99 {offsets = [0, 8, 0], sizes = [2, 1, 160], strides = [1, 1, 1]} : vector<2x16x160xf32> to vector<2x1x160xf32>
    %124 = vector.shape_cast %123 : vector<2x1x160xf32> to vector<2x160xf32>
    %125 = vector.extract_strided_slice %99 {offsets = [0, 10, 0], sizes = [2, 1, 160], strides = [1, 1, 1]} : vector<2x16x160xf32> to vector<2x1x160xf32>
    %126 = vector.shape_cast %125 : vector<2x1x160xf32> to vector<2x160xf32>
    %127 = arith.maximumf %124, %126 : vector<2x160xf32>
    %cst_71 = arith.constant 0.000000e+00 : f32
    %128 = vector.broadcast %cst_71 : f32 to vector<2x160xf32>
    %129 = arith.maximumf %127, %128 : vector<2x160xf32>
    %c2_72 = arith.constant 2 : index
    %c0_73 = arith.constant 0 : index
    %c0_74 = arith.constant 0 : index
    %130 = vector.load %arg6[%c2_72, %c0_73, %c0_74] : memref<4x160x50xf32, #tpu.memory_space<vmem>>, vector<1x160x50xf32>
    %131 = vector.shape_cast %130 : vector<1x160x50xf32> to vector<160x50xf32>
    %cst_75 = arith.constant dense<0.000000e+00> : vector<2x50xf32>
    %132 = tpu.matmul %129, %131, %cst_75 {dimension_numbers = #tpu.dot_dimension_numbers<[1], [0], [0], [1], [0, 0, 1, 1], [], []>} : vector<2x160xf32>, vector<160x50xf32>, vector<2x50xf32> -> vector<2x50xf32>
    %133 = arith.addf %122, %132 : vector<2x50xf32>
    %134 = vector.extract_strided_slice %99 {offsets = [0, 12, 0], sizes = [2, 1, 160], strides = [1, 1, 1]} : vector<2x16x160xf32> to vector<2x1x160xf32>
    %135 = vector.shape_cast %134 : vector<2x1x160xf32> to vector<2x160xf32>
    %136 = vector.extract_strided_slice %99 {offsets = [0, 14, 0], sizes = [2, 1, 160], strides = [1, 1, 1]} : vector<2x16x160xf32> to vector<2x1x160xf32>
    %137 = vector.shape_cast %136 : vector<2x1x160xf32> to vector<2x160xf32>
    %138 = arith.maximumf %135, %137 : vector<2x160xf32>
    %cst_76 = arith.constant 0.000000e+00 : f32
    %139 = vector.broadcast %cst_76 : f32 to vector<2x160xf32>
    %140 = arith.maximumf %138, %139 : vector<2x160xf32>
    %c3_77 = arith.constant 3 : index
    %c0_78 = arith.constant 0 : index
    %c0_79 = arith.constant 0 : index
    %141 = vector.load %arg6[%c3_77, %c0_78, %c0_79] : memref<4x160x50xf32, #tpu.memory_space<vmem>>, vector<1x160x50xf32>
    %142 = vector.shape_cast %141 : vector<1x160x50xf32> to vector<160x50xf32>
    %cst_80 = arith.constant dense<0.000000e+00> : vector<2x50xf32>
    %143 = tpu.matmul %140, %142, %cst_80 {dimension_numbers = #tpu.dot_dimension_numbers<[1], [0], [0], [1], [0, 0, 1, 1], [], []>} : vector<2x160xf32>, vector<160x50xf32>, vector<2x50xf32> -> vector<2x50xf32>
    %144 = arith.addf %133, %143 : vector<2x50xf32>
    %c0_81 = arith.constant 0 : index
    %c0_82 = arith.constant 0 : index
    %145 = vector.load %arg7[%c0_81, %c0_82] : memref<1x50xf32, #tpu.memory_space<vmem>>, vector<1x50xf32>
    %146 = vector.broadcast %145 : vector<1x50xf32> to vector<2x50xf32>
    %147 = arith.addf %144, %146 : vector<2x50xf32>
    %cst_83 = arith.constant 0.000000e+00 : f32
    %148 = vector.broadcast %cst_83 : f32 to vector<2x50xf32>
    %149 = arith.maximumf %147, %148 : vector<2x50xf32>
    %c0_84 = arith.constant 0 : index
    %c0_85 = arith.constant 0 : index
    %150 = vector.load %arg8[%c0_84, %c0_85] : memref<50x10xf32, #tpu.memory_space<vmem>>, vector<50x10xf32>
    %cst_86 = arith.constant dense<0.000000e+00> : vector<2x10xf32>
    %151 = tpu.matmul %149, %150, %cst_86 {dimension_numbers = #tpu.dot_dimension_numbers<[1], [0], [0], [1], [0, 0, 1, 1], [], []>} : vector<2x50xf32>, vector<50x10xf32>, vector<2x10xf32> -> vector<2x10xf32>
    %c0_87 = arith.constant 0 : index
    %c0_88 = arith.constant 0 : index
    %152 = vector.load %arg9[%c0_87, %c0_88] : memref<1x10xf32, #tpu.memory_space<vmem>>, vector<1x10xf32>
    %153 = vector.broadcast %152 : vector<1x10xf32> to vector<2x10xf32>
    %154 = arith.addf %151, %153 : vector<2x10xf32>
    %cst_89 = arith.constant dense<0xFF800000> : vector<2xf32>
    %155 = vector.multi_reduction <maximumf>, %154, %cst_89 [1] : vector<2x10xf32> to vector<2xf32>
    %156 = vector.shape_cast %155 : vector<2xf32> to vector<2x1xf32>
    %157 = vector.broadcast %156 : vector<2x1xf32> to vector<2x10xf32>
    %158 = arith.subf %154, %157 : vector<2x10xf32>
    %159 = math.exp %158 : vector<2x10xf32>
    %cst_90 = arith.constant dense<0.000000e+00> : vector<2xf32>
    %160 = vector.multi_reduction <add>, %159, %cst_90 [1] : vector<2x10xf32> to vector<2xf32>
    %161 = vector.shape_cast %160 : vector<2xf32> to vector<2x1xf32>
    %162 = math.log %161 : vector<2x1xf32>
    %163 = vector.broadcast %162 : vector<2x1xf32> to vector<2x10xf32>
    %164 = arith.subf %158, %163 : vector<2x10xf32>
    %c0_91 = arith.constant 0 : index
    %c0_92 = arith.constant 0 : index
    %165 = vector.load %arg10[%c0_91, %c0_92] : memref<2x10xf32, #tpu.memory_space<vmem>>, vector<2x10xf32>
    tpu.vector_store %arg10[%c0_91, %c0_92], %164 {strides = array<i32>} : memref<2x10xf32, #tpu.memory_space<vmem>>, vector<2x10xf32>,
    return
  }
  func.func @transform_0(%arg0: i32) -> (i32, i32, i32) {
    %c0_i32 = arith.constant 0 : i32
    %c0_i32_0 = arith.constant 0 : i32
    %c0_i32_1 = arith.constant 0 : i32
    return %arg0, %c0_i32, %c0_i32_0 : i32, i32, i32
  }
  func.func @transform_1(%arg0: i32) -> (i32, i32, i32) {
    %c0_i32 = arith.constant 0 : i32
    %c0_i32_0 = arith.constant 0 : i32
    %c0_i32_1 = arith.constant 0 : i32
    %c0_i32_2 = arith.constant 0 : i32
    return %c0_i32, %c0_i32_0, %c0_i32_1 : i32, i32, i32
  }
  func.func @transform_2(%arg0: i32) -> (i32, i32) {
    %c0_i32 = arith.constant 0 : i32
    %c0_i32_0 = arith.constant 0 : i32
    %c0_i32_1 = arith.constant 0 : i32
    return %c0_i32, %c0_i32_0 : i32, i32
  }
  func.func @transform_3(%arg0: i32) -> (i32, i32, i32) {
    %c0_i32 = arith.constant 0 : i32
    %c0_i32_0 = arith.constant 0 : i32
    %c0_i32_1 = arith.constant 0 : i32
    %c0_i32_2 = arith.constant 0 : i32
    return %c0_i32, %c0_i32_0, %c0_i32_1 : i32, i32, i32
  }
  func.func @transform_4(%arg0: i32) -> (i32, i32) {
    %c0_i32 = arith.constant 0 : i32
    %c0_i32_0 = arith.constant 0 : i32
    %c0_i32_1 = arith.constant 0 : i32
    return %c0_i32, %c0_i32_0 : i32, i32
  }
  func.func @transform_5(%arg0: i32) -> (i32, i32, i32) {
    %c0_i32 = arith.constant 0 : i32
    %c0_i32_0 = arith.constant 0 : i32
    %c0_i32_1 = arith.constant 0 : i32
    %c0_i32_2 = arith.constant 0 : i32
    return %c0_i32, %c0_i32_0, %c0_i32_1 : i32, i32, i32
  }
  func.func @transform_6(%arg0: i32) -> (i32, i32) {
    %c0_i32 = arith.constant 0 : i32
    %c0_i32_0 = arith.constant 0 : i32
    %c0_i32_1 = arith.constant 0 : i32
    return %c0_i32, %c0_i32_0 : i32, i32
  }
  func.func @transform_7(%arg0: i32) -> (i32, i32) {
    %c0_i32 = arith.constant 0 : i32
    %c0_i32_0 = arith.constant 0 : i32
    %c0_i32_1 = arith.constant 0 : i32
    return %c0_i32, %c0_i32_0 : i32, i32
  }
  func.func @transform_8(%arg0: i32) -> (i32, i32) {
    %c0_i32 = arith.constant 0 : i32
    %c0_i32_0 = arith.constant 0 : i32
    %c0_i32_1 = arith.constant 0 : i32
    return %c0_i32, %c0_i32_0 : i32, i32
  }
  func.func @transform_9(%arg0: i32) -> (i32, i32) {
    %c0_i32 = arith.constant 0 : i32
    %c0_i32_0 = arith.constant 0 : i32
    return %arg0, %c0_i32 : i32, i32
  }
}

</mosaic_0001>

<bundles_post_ra>
// kernel: cnn_forward.1
= control target key start
LH: loop header
LB: loop body
LE: loop exit
PB: predicated region body
PF: predicated region fallthrough
CT: control target
= control target key end

     0   :  { %vm81_vm0 = vcmask 1043456   ;;  %v2985_v6 = vmov 0.0   ;;  %vm62_vm1 = vcmask 228352   ;;  %s5107_s0 = inlined_call_operand.vmem [shape: f32[2,28,28], index: 0, kind: input, shape index: {}]   ;;  %s5108_s1 = inlined_call_operand.vmem [shape: f32[5,28,240], index: 1, kind: input, shape index: {}]   ;;  %s5109_s2 = inlined_call_operand.vmem [shape: f32[1,240], index: 2, kind: input, shape index: {}]   ;;  %s5110_s3 = inlined_call_operand.vmem [shape: f32[5,240,160], index: 3, kind: input, shape index: {}]   ;;  %s5111_s4 = inlined_call_operand.vmem [shape: f32[1,160], index: 4, kind: input, shape index: {}]   ;;  %s5112_s5 = inlined_call_operand.vmem [shape: f32[4,160,50], index: 5, kind: input, shape index: {}]   ;;  %s5113_s6 = inlined_call_operand.vmem [shape: f32[1,50], index: 6, kind: input, shape index: {}]   ;;  %s5114_s7 = inlined_call_operand.vmem [shape: f32[50,10], index: 7, kind: input, shape index: {}]   ;;  %s5115_s8 = inlined_call_operand.vmem [shape: f32[1,10], index: 8, kind: input, shape index: {}]   ;;  %s5116_s9 = inlined_call_operand.hbm [shape: f32[2,10], index: 9, kind: output, shape index: {}]  }
   0x1   :  { %v2510_v0 = vld [vmem:[%s5108_s1 + $0x78] sm:$0xf]  ;;  %v2509_v1 = vld [vmem:[%s5108_s1 + $0x70] sm:$0xf]  ;;  %v2508_v2 = vld [vmem:[%s5108_s1 + $0x68] sm:$0xff]  ;;  %152 = vmatprep.mubr.f32.mxu0 %v2985_v6  ;;  %289 = vmatprep.mubr.f32.mxu1 %v2985_v6 }
   0x2   :  { %2511 = vmatprep.subr.msk.mxu0 %vm81_vm0, %v2510_v0  ;;  %v2507_v3 = vld [vmem:[%s5108_s1 + $0x60] sm:$0xff]  ;;  %v2506_v4 = vld [vmem:[%s5108_s1 + $0x58] sm:$0xff]  ;;  %v2505_v5 = vld [vmem:[%s5108_s1 + $0x50] sm:$0xff] }
   0x3   :  { %2512 = vmatpush1.msk.msra.mxu0 %vm81_vm0, %v2509_v1  ;;  %v46_v7 = vld [vmem:[%s5108_s1 + $0x38] sm:$0xf]  ;;  %v45_v8 = vld [vmem:[%s5108_s1 + $0x30] sm:$0xf]  ;;  %v44_v9 = vld [vmem:[%s5108_s1 + $0x28] sm:$0xff] }
   0x4   :  { %114 = vmatprep.subr.mxu0 %v2508_v2  ;;  %v2504_v10 = vld [vmem:[%s5108_s1 + $0x48] sm:$0xff]  ;;  %2932 = vmatprep.subr.msk.mxu1 %vm81_vm0, %v46_v7  ;;  %v43_v11 = vld [vmem:[%s5108_s1 + $0x20] sm:$0xff]  ;;  %v42_v13 = vld [vmem:[%s5108_s1 + $0x18] sm:$0xff] }
   0x5   :  { %115 = vmatpush1.msra.mxu0 %v2507_v3  ;;  %v2503_v12 = vld [vmem:[%s5108_s1 + $0x40] sm:$0xff]  ;;  %2936 = vmatpush1.msk.msra.mxu1 %vm81_vm0, %v45_v8  ;;  %v41_v15 = vld [vmem:[%s5108_s1 + $0x10] sm:$0xff]  ;;  %v40_v16 = vld [vmem:[%s5108_s1 + $0x8] sm:$0xff] }
   0x6   :  { %116 = vmatprep.subr.mxu0 %v2506_v4  ;;  %v47_v14 = vld [vmem:[%s5107_s0 + $0x1] sm:$0xff]  ;;  %2933 = vmatprep.subr.mxu1 %v44_v9  ;;  %v48_v17 = vld [vmem:[%s5107_s0 + $0x9] sm:$0xff]  ;;  %v2550_v20 = vld [vmem:[%s5108_s1 + $0xf8] sm:$0xf] }
   0x7   :  { %117 = vmatpush1.msra.mxu0 %v2505_v5  ;;  %2937 = vmatpush1.msra.mxu1 %v43_v11  ;;  %v39_v18 = vld [vmem:[%s5108_s1] sm:$0xff]  ;;  %v35_v19 = vld [vmem:[%s5107_s0 + $0x10] sm:$0xff]  ;;  %v2534_v23 = vld [vmem:[%s5108_s1 + $0xb8] sm:$0xf] }
   0x8   :  { %118 = vmatprep.subr.mxu0 %v2504_v10  ;;  %2934 = vmatprep.subr.mxu1 %v42_v13  ;;  %v49_v21 = vld [vmem:[%s5107_s0 + $0x11] sm:$0xff]  ;;  %v36_v22 = vld [vmem:[%s5107_s0 + $0x20] sm:$0xff]  ;;  %v2548_v26 = vld [vmem:[%s5108_s1 + $0xe8] sm:$0xff] }
   0x9   :  { %119 = vmatpush1.msra.mxu0 %v2503_v12  ;;  %2938 = vmatpush1.msra.mxu1 %v41_v15  ;;  %v2549_v24 = vld [vmem:[%s5108_s1 + $0xf0] sm:$0xf]  ;;  %v50_v25 = vld [vmem:[%s5107_s0 + $0x21] sm:$0xff]  ;;  %v2546_v29 = vld [vmem:[%s5108_s1 + $0xd8] sm:$0xff] }
   0xa   :  { %2513 = vmatmul.mubr.msk.f32.vlgmr.msra.gmra.mxu0 %vm62_vm1, %v47_v14  ;;  %2519 = vmatprep.subr.msk.mxu0 %vm81_vm0, %v46_v7  ;;  %v37_v27 = vld [vmem:[%s5107_s0 + $0x28] sm:$0xff]  ;;  %v2547_v28 = vld [vmem:[%s5108_s1 + $0xe0] sm:$0xff]  ;;  %v2545_v31 = vld [vmem:[%s5108_s1 + $0xd0] sm:$0xff] }
   0xb   :  { %2520 = vmatpush1.msk.msra.mxu0 %vm81_vm0, %v45_v8  ;;  %158 = vmatprep.mubr.f32.mxu0 %v2985_v6  ;;  %v51_v30 = vld [vmem:[%s5107_s0 + $0x29] sm:$0xff] }
   0xc   :  { %239 = vmatprep.subr.mxu0 %v44_v9  ;;  %2935 = vmatprep.subr.mxu1 %v40_v16  ;;  %v38_v32 = vld [vmem:[%s5107_s0 + $0x30] sm:$0xff] }
   0xd   :  { %240 = vmatpush1.msra.mxu0 %v43_v11  ;;  %2939 = vmatpush1.msra.mxu1 %v39_v18 }
   0xe   :  { %2514 = vmatmul.mubr.msk.f32.gmra.mxu0 %vm62_vm1, %v48_v17  ;;  %2523 = vmatmul.mubr.msk.f32.vlgmr.msra.gmra.mxu1 %vm62_vm1, %v35_v19 }
   0xf   :  { %164 = vmatprep.mubr.f32.mxu0 %v2985_v6  ;;  %295 = vmatprep.mubr.f32.mxu1 %v2985_v6 }
  0x10   :  { %241 = vmatprep.subr.mxu0 %v42_v13  ;;  %2551 = vmatprep.subr.msk.mxu1 %vm81_vm0, %v2550_v20 }
  0x11   :  { %242 = vmatpush1.msra.mxu0 %v41_v15  ;;  %2552 = vmatpush1.msk.msra.mxu1 %vm81_vm0, %v2549_v24 }
  0x12   :  { %2515 = vmatmul.mubr.msk.f32.gmra.mxu0 %vm62_vm1, %v49_v21  ;;  %243 = vmatprep.subr.mxu0 %v40_v16 }
  0x13   :  { %170 = vmatprep.mubr.f32.mxu0 %v2985_v6  ;;  %2524 = vmatmul.mubr.msk.f32.gmra.mxu1 %vm62_vm1, %v36_v22 }
  0x14   :  { %301 = vmatprep.mubr.f32.mxu1 %v2985_v6  ;;  %244 = vmatpush1.msra.mxu0 %v39_v18 }
  0x15   :  { %2535 = vmatprep.subr.msk.mxu0 %vm81_vm0, %v2534_v23  ;;  %531 = vmatprep.subr.mxu1 %v2548_v26 }
  0x16   :  { %2516 = vmatmul.mubr.msk.f32.gmra.mxu0 %vm62_vm1, %v50_v25  ;;  %532 = vmatpush1.msra.mxu1 %v2547_v28 }
  0x17   :  { %176 = vmatprep.mubr.f32.mxu0 %v2985_v6  ;;  %2525 = vmatmul.mubr.msk.f32.gmra.mxu1 %vm62_vm1, %v37_v27 }
  0x18   :  { %307 = vmatprep.mubr.f32.mxu1 %v2985_v6 }
  0x19   :  { %14 = vsyncpa [#allocation3], 0  ;;  %533 = vmatprep.subr.mxu1 %v2546_v29  ;;  %v2544_v33 = vld [vmem:[%s5108_s1 + $0xc8] sm:$0xff]  ;;  %v2543_v34 = vld [vmem:[%s5108_s1 + $0xc0] sm:$0xff]  ;;  %s2986_s13 = smov 127   ;;  %vm849_vm2 = vcmask 908288  }
  0x1a   :  { %2517 = vmatmul.mubr.msk.f32.gmra.mxu0 %vm62_vm1, %v51_v30  ;;  %534 = vmatpush1.msra.mxu1 %v2545_v31  ;;  %v52_v35 = vld [vmem:[%s5107_s0 + $0x31] sm:$0xff]  ;;  %v466_v36 = vld [vmem:[%s5107_s0 + $0x3] sm:$0xff]  ;;  %vm884_vm3 = vcmask 1046528   ;;  %vm830_vm4 = vcmask 1039360   ;;  %vm1099_vm5 = vcmask 916480   ;;  %vm1013_vm6 = vcmask 1045504  }
  0x1b   :  { %182 = vmatprep.mubr.f32.mxu0 %v2985_v6  ;;  %2526 = vmatmul.mubr.msk.f32.gmra.mxu1 %vm62_vm1, %v38_v32  ;;  %v33_v37 = vld [vmem:[%s5107_s0] sm:$0xff]  ;;  %v2533_v38 = vld [vmem:[%s5108_s1 + $0xb0] sm:$0xf]  ;;  %v2532_v39 = vld [vmem:[%s5108_s1 + $0xa8] sm:$0xff]  ;;  %vm1484_vm7 = vcmask 1041408   ;;  %vm1915_vm8 = vcmask 252928  }
  0x1c   :  { %535 = vmatprep.subr.mxu1 %v2544_v33  ;;  %569 = vmatprep.mubr.f32.mxu1 %v2985_v6  ;;  %v467_v40 = vld [vmem:[%s5107_s0 + $0xb] sm:$0xff]  ;;  %v2531_v41 = vld [vmem:[%s5108_s1 + $0xa0] sm:$0xff]  ;;  %v2530_v43 = vld [vmem:[%s5108_s1 + $0x98] sm:$0xff]  ;;  %vm1995_vm9 = vcmask 1041409   ;;  %vm2001_vm10 = vcmask 261120   ;;  %vm2987_vm11 = vmmov 0  }
  0x1d   :  { %536 = vmatpush1.msra.mxu1 %v2543_v34  ;;  %v34_v42 = vld [vmem:[%s5107_s0 + $0x8] sm:$0xff]  ;;  %v2529_v44 = vld [vmem:[%s5108_s1 + $0x90] sm:$0xff]  ;;  %v2527_v47 = vld [vmem:[%s5108_s1 + $0x80] sm:$0xff]  ;;  %vm2398_vm12 = vcmask 408576   ;;  %vm2475_vm13 = vcmask 74752  }
  0x1e   :  { %2518 = vmatmul.mubr.msk.f32.gmra.mxu0 %vm62_vm1, %v52_v35  ;;  %v2528_v45 = vld [vmem:[%s5108_s1 + $0x88] sm:$0xff]  ;;  %v468_v46 = vld [vmem:[%s5107_s0 + $0x13] sm:$0xff]  ;;  %v2563_v53 = vld [vmem:[%s5108_s1 + $0x120] sm:$0xff] }
  0x1f   :  { %277 = vmatprep.mubr.f32.mxu0 %v2985_v6  ;;  %2553 = vmatmul.mubr.msk.f32.vlgmr.msra.gmra.mxu1 %vm62_vm1, %v466_v36  ;;  %v314_v48 = vld [vmem:[%s5107_s0 + $0x2] sm:$0xff]  ;;  %v2566_v49 = vld [vmem:[%s5108_s1 + $0x138] sm:$0xf]  ;;  %v2565_v50 = vld [vmem:[%s5108_s1 + $0x130] sm:$0xf] }
  0x20   :  { %575 = vmatprep.mubr.f32.mxu1 %v2985_v6  ;;  %v2564_v51 = vld [vmem:[%s5108_s1 + $0x128] sm:$0xff]  ;;  %v2562_v55 = vld [vmem:[%s5108_s1 + $0x118] sm:$0xff]  ;;  %v2561_v56 = vld [vmem:[%s5108_s1 + $0x110] sm:$0xff] }
  0x21   :  { %v469_v52 = vld [vmem:[%s5107_s0 + $0x23] sm:$0xff]  ;;  %v470_v57 = vld [vmem:[%s5107_s0 + $0x2b] sm:$0xff]  ;;  %v471_v61 = vld [vmem:[%s5107_s0 + $0x33] sm:$0xff] }
  0x22   :  { %2521 = vmatmul.mubr.msk.f32.vlgmr.msra.gmra.mxu0 %vm62_vm1, %v33_v37  ;;  %v315_v54 = vld [vmem:[%s5107_s0 + $0xa] sm:$0xff]  ;;  %v2559_v59 = vld [vmem:[%s5108_s1 + $0x100] sm:$0xff]  ;;  %v316_v60 = vld [vmem:[%s5107_s0 + $0x12] sm:$0xff] }
  0x23   :  { %2536 = vmatpush1.msk.msra.mxu0 %vm81_vm0, %v2533_v38  ;;  %283 = vmatprep.mubr.f32.mxu0 %v2985_v6  ;;  %v2560_v58 = vld [vmem:[%s5108_s1 + $0x108] sm:$0xff]  ;;  %v319_v0 = vld [vmem:[%s5107_s0 + $0x32] sm:$0xff]  ;;  %v957_v12 = vld [vmem:[%s5110_s3 + $0xe0] sm:$0xff] }
  0x24   :  { %379 = vmatprep.subr.mxu0 %v2532_v39  ;;  %2554 = vmatmul.mubr.msk.f32.gmra.mxu1 %vm62_vm1, %v467_v40  ;;  %v317_v62 = vld [vmem:[%s5107_s0 + $0x22] sm:$0xff]  ;;  %v318_v63 = vld [vmem:[%s5107_s0 + $0x2a] sm:$0xff]  ;;  %v620_v3 = vld [vmem:[%s5107_s0 + $0x14] sm:$0xff] }
  0x25   :  { %380 = vmatpush1.msra.mxu0 %v2531_v41  ;;  %581 = vmatprep.mubr.f32.mxu1 %v2985_v6  ;;  %v618_v1 = vld [vmem:[%s5107_s0 + $0x4] sm:$0xff]  ;;  %v619_v2 = vld [vmem:[%s5107_s0 + $0xc] sm:$0xff]  ;;  %v623_v7 = vld [vmem:[%s5107_s0 + $0x34] sm:$0xff] }
  0x26   :  { %2522 = vmatmul.mubr.msk.f32.gmra.mxu0 %vm62_vm1, %v34_v42  ;;  %381 = vmatprep.subr.mxu0 %v2530_v43  ;;  %v621_v4 = vld [vmem:[%s5107_s0 + $0x24] sm:$0xff]  ;;  %v622_v5 = vld [vmem:[%s5107_s0 + $0x2c] sm:$0xff]  ;;  %v960_v8 = vld [vmem:[%s5110_s3 + $0xf8] sm:$0xff] }
  0x27   :  { %382 = vmatpush1.msra.mxu0 %v2529_v44  ;;  %417 = vmatprep.mubr.f32.mxu0 %v2985_v6  ;;  %v959_v9 = vld [vmem:[%s5110_s3 + $0xf0] sm:$0xff]  ;;  %v958_v10 = vld [vmem:[%s5110_s3 + $0xe8] sm:$0xff]  ;;  %v2606_v11 = vld [vmem:[%s5110_s3 + $0x2d8] sm:$0xff] }
  0x28   :  { %383 = vmatprep.subr.mxu0 %v2528_v45  ;;  %2555 = vmatmul.mubr.msk.f32.gmra.mxu1 %vm62_vm1, %v468_v46  ;;  %v2605_v13 = vld [vmem:[%s5110_s3 + $0x2d0] sm:$0xff]  ;;  %v956_v14 = vld [vmem:[%s5110_s3 + $0xd8] sm:$0xff]  ;;  %v2604_v15 = vld [vmem:[%s5110_s3 + $0x2c8] sm:$0xff] }
  0x29   :  { %384 = vmatpush1.msra.mxu0 %v2527_v47  ;;  %587 = vmatprep.mubr.f32.mxu1 %v2985_v6  ;;  %v955_v16 = vld [vmem:[%s5110_s3 + $0xd0] sm:$0xff]  ;;  %v2603_v17 = vld [vmem:[%s5110_s3 + $0x2c0] sm:$0xff]  ;;  %v2602_v18 = vld [vmem:[%s5110_s3 + $0x2b8] sm:$0xff] }
  0x2a   :  { %2537 = vmatmul.mubr.msk.f32.vlgmr.msra.gmra.mxu0 %vm62_vm1, %v314_v48  ;;  %2567 = vmatprep.subr.msk.mxu0 %vm81_vm0, %v2566_v49  ;;  %v954_v19 = vld [vmem:[%s5110_s3 + $0xc8] sm:$0xff]  ;;  %v2601_v20 = vld [vmem:[%s5110_s3 + $0x2b0] sm:$0xff]  ;;  %v953_v21 = vld [vmem:[%s5110_s3 + $0xc0] sm:$0xff] }
  0x2b   :  { %2568 = vmatpush1.msk.msra.mxu0 %vm81_vm0, %v2565_v50  ;;  %423 = vmatprep.mubr.f32.mxu0 %v2985_v6  ;;  %v2600_v22 = vld [vmem:[%s5110_s3 + $0x2a8] sm:$0xff]  ;;  %v952_v23 = vld [vmem:[%s5110_s3 + $0xb8] sm:$0xff]  ;;  %v2599_v24 = vld [vmem:[%s5110_s3 + $0x2a0] sm:$0xff] }
  0x2c   :  { %683 = vmatprep.subr.mxu0 %v2564_v51  ;;  %2556 = vmatmul.mubr.msk.f32.gmra.mxu1 %vm62_vm1, %v469_v52  ;;  %v951_v25 = vld [vmem:[%s5110_s3 + $0xb0] sm:$0xff]  ;;  %v2598_v26 = vld [vmem:[%s5110_s3 + $0x298] sm:$0xff]  ;;  %v950_v27 = vld [vmem:[%s5110_s3 + $0xa8] sm:$0xff] }
  0x2d   :  { %684 = vmatpush1.msra.mxu0 %v2563_v53  ;;  %593 = vmatprep.mubr.f32.mxu1 %v2985_v6  ;;  %v2597_v28 = vld [vmem:[%s5110_s3 + $0x290] sm:$0xff]  ;;  %v949_v29 = vld [vmem:[%s5110_s3 + $0xa0] sm:$0xff]  ;;  %v2596_v30 = vld [vmem:[%s5110_s3 + $0x288] sm:$0xff] }
  0x2e   :  { %2538 = vmatmul.mubr.msk.f32.gmra.mxu0 %vm62_vm1, %v315_v54  ;;  %685 = vmatprep.subr.mxu0 %v2562_v55  ;;  %v948_v31 = vld [vmem:[%s5110_s3 + $0x98] sm:$0xff]  ;;  %v2595_v32 = vld [vmem:[%s5110_s3 + $0x280] sm:$0xff]  ;;  %v947_v33 = vld [vmem:[%s5110_s3 + $0x90] sm:$0xff] }
  0x2f   :  { %429 = vmatprep.mubr.f32.mxu0 %v2985_v6  ;;  %686 = vmatpush1.msra.mxu0 %v2561_v56  ;;  %v2594_v34 = vld [vmem:[%s5110_s3 + $0x278] sm:$0xff]  ;;  %v946_v35 = vld [vmem:[%s5110_s3 + $0x88] sm:$0xff]  ;;  %v2593_v36 = vld [vmem:[%s5110_s3 + $0x270] sm:$0xff] }
  0x30   :  { %2557 = vmatmul.mubr.msk.f32.gmra.mxu1 %vm62_vm1, %v470_v57  ;;  %687 = vmatprep.subr.mxu0 %v2560_v58  ;;  %v945_v37 = vld [vmem:[%s5110_s3 + $0x80] sm:$0xff]  ;;  %v2592_v38 = vld [vmem:[%s5110_s3 + $0x268] sm:$0xff]  ;;  %v944_v39 = vld [vmem:[%s5110_s3 + $0x78] sm:$0xff] }
  0x31   :  { %688 = vmatpush1.msra.mxu0 %v2559_v59  ;;  %599 = vmatprep.mubr.f32.mxu1 %v2985_v6  ;;  %v2591_v40 = vld [vmem:[%s5110_s3 + $0x260] sm:$0xff]  ;;  %v943_v41 = vld [vmem:[%s5110_s3 + $0x70] sm:$0xff]  ;;  %v2590_v42 = vld [vmem:[%s5110_s3 + $0x258] sm:$0xff] }
  0x32   :  { %2539 = vmatmul.mubr.msk.f32.gmra.mxu0 %vm62_vm1, %v316_v60  ;;  %1205 = vmatprep.subr.mxu0 %v960_v8  ;;  %v942_v43 = vld [vmem:[%s5110_s3 + $0x68] sm:$0xff]  ;;  %v2589_v44 = vld [vmem:[%s5110_s3 + $0x250] sm:$0xff]  ;;  %v941_v45 = vld [vmem:[%s5110_s3 + $0x60] sm:$0xff] }
  0x33   :  { %435 = vmatprep.mubr.f32.mxu0 %v2985_v6  ;;  %1108 = vmatprep.subr.mxu1 %v2606_v11  ;;  %v2588_v46 = vld [vmem:[%s5110_s3 + $0x248] sm:$0xff]  ;;  %v940_v47 = vld [vmem:[%s5110_s3 + $0x58] sm:$0xff]  ;;  %v2587_v48 = vld [vmem:[%s5110_s3 + $0x240] sm:$0xff] }
  0x34   :  { %2558 = vmatmul.mubr.msk.f32.gmra.mxu1 %vm62_vm1, %v471_v61  ;;  %v939_v49 = vld [vmem:[%s5110_s3 + $0x50] sm:$0xff]  ;;  %v2586_v50 = vld [vmem:[%s5110_s3 + $0x238] sm:$0xff]  ;;  %v938_v51 = vld [vmem:[%s5110_s3 + $0x48] sm:$0xff] }
  0x35   :  { %1109 = vmatpush1.msra.mxu1 %v2605_v13  ;;  %v2585_v52 = vld [vmem:[%s5110_s3 + $0x230] sm:$0xff]  ;;  %v937_v53 = vld [vmem:[%s5110_s3 + $0x40] sm:$0xff]  ;;  %v2584_v54 = vld [vmem:[%s5110_s3 + $0x228] sm:$0xff] }
  0x36   :  { %2540 = vmatmul.mubr.msk.f32.gmra.mxu0 %vm62_vm1, %v317_v62  ;;  %1110 = vmatprep.subr.mxu1 %v2604_v15  ;;  %v936_v55 = vld [vmem:[%s5110_s3 + $0x38] sm:$0xff]  ;;  %v2583_v56 = vld [vmem:[%s5110_s3 + $0x220] sm:$0xff]  ;;  %v935_v57 = vld [vmem:[%s5110_s3 + $0x30] sm:$0xff] }
  0x37   :  { %441 = vmatprep.mubr.f32.mxu0 %v2985_v6  ;;  %1111 = vmatpush1.msra.mxu1 %v2603_v17  ;;  %v2582_v58 = vld [vmem:[%s5110_s3 + $0x218] sm:$0xff]  ;;  %v934_v59 = vld [vmem:[%s5110_s3 + $0x28] sm:$0xff]  ;;  %v2581_v60 = vld [vmem:[%s5110_s3 + $0x210] sm:$0xff] }
  0x38   :  { %1112 = vmatprep.subr.mxu1 %v2602_v18  ;;  %v933_v61 = vld [vmem:[%s5110_s3 + $0x20] sm:$0xff]  ;;  %v2580_v62 = vld [vmem:[%s5110_s3 + $0x208] sm:$0xff]  ;;  %v988_v8 = vld [vmem:[%s5110_s3 + $0x1d8] sm:$0xff] }
  0x39   :  { %1113 = vmatpush1.msra.mxu1 %v2601_v20  ;;  %v2634_v11 = vld [vmem:[%s5110_s3 + $0x3b8] sm:$0xff]  ;;  %v2633_v13 = vld [vmem:[%s5110_s3 + $0x3b0] sm:$0xff] }
  0x3a   :  { %2541 = vmatmul.mubr.msk.f32.gmra.mxu0 %vm62_vm1, %v318_v63  ;;  %1114 = vmatprep.subr.mxu1 %v2600_v22  ;;  %v932_v63 = vld [vmem:[%s5110_s3 + $0x18] sm:$0xff] }
  0x3b   :  { %447 = vmatprep.mubr.f32.mxu0 %v2985_v6  ;;  %1115 = vmatpush1.msra.mxu1 %v2599_v24  ;;  %v984_v15 = vld [vmem:[%s5110_s3 + $0x1b8] sm:$0xff] }
  0x3c   :  { %1116 = vmatprep.subr.mxu1 %v2598_v26 }
  0x3d   :  { %1117 = vmatpush1.msra.mxu1 %v2597_v28 }
  0x3e   :  { %2542 = vmatmul.mubr.msk.f32.gmra.mxu0 %vm62_vm1, %v319_v0  ;;  %1118 = vmatprep.subr.mxu1 %v2596_v30  ;;  %v2579_v0 = vld [vmem:[%s5110_s3 + $0x200] sm:$0xff] }
  0x3f   :  { %721 = vmatprep.mubr.f32.mxu0 %v2985_v6  ;;  %1119 = vmatpush1.msra.mxu1 %v2595_v32 }
  0x40   :  { %1120 = vmatprep.subr.mxu1 %v2594_v34 }
  0x41   :  { %1121 = vmatpush1.msra.mxu1 %v2593_v36 }
  0x42   :  { %2569 = vmatmul.mubr.msk.f32.vlgmr.msra.gmra.mxu0 %vm62_vm1, %v618_v1  ;;  %1122 = vmatprep.subr.mxu1 %v2592_v38  ;;  %v931_v1 = vld [vmem:[%s5110_s3 + $0x10] sm:$0xff] }
  0x43   :  { %727 = vmatprep.mubr.f32.mxu0 %v2985_v6  ;;  %1206 = vmatpush1.msra.mxu0 %v959_v9  ;;  %v2575_v9 = vld [vmem:[%s5110_s3 + $0x1e0] sm:$0xff] }
  0x44   :  { %1207 = vmatprep.subr.mxu0 %v958_v10  ;;  %1123 = vmatpush1.msra.mxu1 %v2591_v40  ;;  %v987_v10 = vld [vmem:[%s5110_s3 + $0x1d0] sm:$0xff] }
  0x45   :  { %1208 = vmatpush1.msra.mxu0 %v957_v12  ;;  %1124 = vmatprep.subr.mxu1 %v2590_v42  ;;  %v986_v12 = vld [vmem:[%s5110_s3 + $0x1c8] sm:$0xff] }
  0x46   :  { %2570 = vmatmul.mubr.msk.f32.gmra.mxu0 %vm62_vm1, %v619_v2  ;;  %1209 = vmatprep.subr.mxu0 %v956_v14  ;;  %v2578_v2 = vld [vmem:[%s5110_s3 + $0x1f8] sm:$0xff]  ;;  %v985_v14 = vld [vmem:[%s5110_s3 + $0x1c0] sm:$0xff] }
  0x47   :  { %733 = vmatprep.mubr.f32.mxu0 %v2985_v6  ;;  %1210 = vmatpush1.msra.mxu0 %v955_v16 }
  0x48   :  { %1211 = vmatprep.subr.mxu0 %v954_v19  ;;  %1125 = vmatpush1.msra.mxu1 %v2589_v44 }
  0x49   :  { %1212 = vmatpush1.msra.mxu0 %v953_v21  ;;  %1126 = vmatprep.subr.mxu1 %v2588_v46 }
  0x4a   :  { %2571 = vmatmul.mubr.msk.f32.gmra.mxu0 %vm62_vm1, %v620_v3  ;;  %1213 = vmatprep.subr.mxu0 %v952_v23  ;;  %v930_v3 = vld [vmem:[%s5110_s3 + $0x8] sm:$0xff] }
  0x4b   :  { %739 = vmatprep.mubr.f32.mxu0 %v2985_v6  ;;  %1214 = vmatpush1.msra.mxu0 %v951_v25 }
  0x4c   :  { %1215 = vmatprep.subr.mxu0 %v950_v27  ;;  %1127 = vmatpush1.msra.mxu1 %v2587_v48 }
  0x4d   :  { %1216 = vmatpush1.msra.mxu0 %v949_v29  ;;  %1128 = vmatprep.subr.mxu1 %v2586_v50 }
  0x4e   :  { %2572 = vmatmul.mubr.msk.f32.gmra.mxu0 %vm62_vm1, %v621_v4  ;;  %1217 = vmatprep.subr.mxu0 %v948_v31  ;;  %v2577_v4 = vld [vmem:[%s5110_s3 + $0x1f0] sm:$0xff] }
  0x4f   :  { %745 = vmatprep.mubr.f32.mxu0 %v2985_v6  ;;  %1218 = vmatpush1.msra.mxu0 %v947_v33 }
  0x50   :  { %1219 = vmatprep.subr.mxu0 %v946_v35  ;;  %1129 = vmatpush1.msra.mxu1 %v2585_v52 }
  0x51   :  { %1220 = vmatpush1.msra.mxu0 %v945_v37  ;;  %1130 = vmatprep.subr.mxu1 %v2584_v54 }
  0x52   :  { %2573 = vmatmul.mubr.msk.f32.gmra.mxu0 %vm62_vm1, %v622_v5  ;;  %1221 = vmatprep.subr.mxu0 %v944_v39  ;;  %v929_v5 = vld [vmem:[%s5110_s3] sm:$0xff] }
  0x53   :  { %751 = vmatprep.mubr.f32.mxu0 %v2985_v6  ;;  %1222 = vmatpush1.msra.mxu0 %v943_v41 }
  0x54   :  { %1223 = vmatprep.subr.mxu0 %v942_v43  ;;  %1131 = vmatpush1.msra.mxu1 %v2583_v56  ;;  %v983_v56 = vld [vmem:[%s5110_s3 + $0x1b0] sm:$0xff] }
  0x55   :  { %1224 = vmatpush1.msra.mxu0 %v941_v45  ;;  %1132 = vmatprep.subr.mxu1 %v2582_v58 }
  0x56   :  { %2574 = vmatmul.mubr.msk.f32.gmra.mxu0 %vm62_vm1, %v623_v7  ;;  %1225 = vmatprep.subr.mxu0 %v940_v47  ;;  %v2576_v7 = vld [vmem:[%s5110_s3 + $0x1e8] sm:$0xff] }
  0x57   :  { %1226 = vmatpush1.msra.mxu0 %v939_v49  ;;  %1133 = vmatpush1.msra.mxu1 %v2581_v60  ;;  %v2631_v60 = vld [vmem:[%s5110_s3 + $0x3a0] sm:$0xff] }
  0x58   :  { %1227 = vmatprep.subr.mxu0 %v938_v51  ;;  %1134 = vmatprep.subr.mxu1 %v2580_v62 }
  0x59   :  { %1228 = vmatpush1.msra.mxu0 %v937_v53  ;;  %1135 = vmatpush1.msra.mxu1 %v2579_v0  ;;  %v772_v53 = vlaneseq  ;;  %v981_v0 = vld [vmem:[%s5110_s3 + $0x1a0] sm:$0xff] }
  0x5a   :  { %1229 = vmatprep.subr.mxu0 %v936_v55  ;;  %1136 = vmatprep.subr.mxu1 %v2578_v2  ;;  %v2632_v55 = vld [vmem:[%s5110_s3 + $0x3a8] sm:$0xff] }
  0x5b   :  { %1230 = vmatpush1.msra.mxu0 %v935_v57  ;;  %1137 = vmatpush1.msra.mxu1 %v2577_v4  ;;  %v980_v4 = vld [vmem:[%s5110_s3 + $0x198] sm:$0xff] }
  0x5c   :  { %1231 = vmatprep.subr.mxu0 %v934_v59  ;;  %1138 = vmatprep.subr.mxu1 %v2576_v7  ;;  %v3606_v59 = vshrl.u32 %v772_v53, 7  ;;  %v2628_v7 = vld [vmem:[%s5110_s3 + $0x388] sm:$0xff]  ;;  %v976_v53 = vld [vmem:[%s5110_s3 + $0x178] sm:$0xff] }
  0x5d   :  { %1232 = vmatpush1.msra.mxu0 %v933_v61  ;;  %1139 = vmatpush1.msra.mxu1 %v2575_v9  ;;  %v982_v61 = vld [vmem:[%s5110_s3 + $0x1a8] sm:$0xff] }
  0x5e   :  { %1233 = vmatprep.subr.mxu0 %v932_v63  ;;  %1144 = vmatprep.subr.mxu1 %v2634_v11  ;;  %v2630_v63 = vld [vmem:[%s5110_s3 + $0x398] sm:$0xff]  ;;  %v778_v2 = vsub.s32 1, %v3606_v59  ;;  %v2627_v11 = vld [vmem:[%s5110_s3 + $0x380] sm:$0xff] }
  0x5f   :  { %1234 = vmatpush1.msra.mxu0 %v931_v1  ;;  %1145 = vmatpush2.msra.mxu1 %v2633_v13 }
  0x60   :  { %1235 = vmatprep.subr.mxu0 %v930_v3  ;;  %1146 = vmatprep.subr.mxu1 %v2632_v55  ;;  %v2629_v3 = vld [vmem:[%s5110_s3 + $0x390] sm:$0xff] }
  0x61   :  { %1236 = vmatpush1.msra.mxu0 %v929_v5  ;;  %1147 = vmatpush2.msra.mxu1 %v2631_v60  ;;  %v975_v60 = vld [vmem:[%s5110_s3 + $0x170] sm:$0xff] }
  0x62   :  { %1241 = vmatprep.subr.mxu0 %v988_v8  ;;  %1148 = vmatprep.subr.mxu1 %v2630_v63  ;;  %v979_v8 = vld [vmem:[%s5110_s3 + $0x190] sm:$0xff] }
  0x63   :  { %1242 = vmatpush2.msra.mxu0 %v987_v10  ;;  %1149 = vmatpush2.msra.mxu1 %v2629_v3 }
  0x64   :  { %1243 = vmatprep.subr.mxu0 %v986_v12  ;;  %1150 = vmatprep.subr.mxu1 %v2628_v7  ;;  %v978_v12 = vld [vmem:[%s5110_s3 + $0x188] sm:$0xff] }
  0x65   :  { %1244 = vmatpush2.msra.mxu0 %v985_v14  ;;  %v770_v14 = vld [vmem:[%s5109_s2] sm:$0x3]  ;;  %1151 = vmatpush2.msra.mxu1 %v2627_v11 }
  0x66   :  { %1245 = vmatprep.subr.mxu0 %v984_v15  ;;  %v2626_v15 = vld [vmem:[%s5110_s3 + $0x378] sm:$0xff] }
  0x67   :  { %1246 = vmatpush2.msra.mxu0 %v983_v56  ;;  %1152 = vmatprep.subr.mxu1 %v2626_v15  ;;  %v2619_v15 = vld [vmem:[%s5110_s3 + $0x340] sm:$0xff] }
  0x68   :  { %1247 = vmatprep.subr.mxu0 %v982_v61 }
  0x69   :  { %1248 = vmatpush2.msra.mxu0 %v981_v0  ;;  %v973_v0 = vld [vmem:[%s5110_s3 + $0x160] sm:$0xff] }
  0x6a   :  { %1249 = vmatprep.subr.mxu0 %v980_v4 }
  0x6b   :  { %1250 = vmatpush2.msra.mxu0 %v979_v8 }
  0x6c   :  { %1251 = vmatprep.subr.mxu0 %v978_v12 }
  0xca   :  { %v3534_v16 = vpop.f32.mrf.mxu0 }
  0xcc   :  { %v156_v17 = vpop.f32.mrf.mxu0 }
  0xce   :  { %v3536_v18 = vpop.f32.mrf.mxu0  ;;  %v3538_v19 = vpop.f32.mrf.mxu1 }
  0xd0   :  { %v3540_v20 = vpop.f32.mrf.mxu0  ;;  %v3542_v21 = vpop.f32.mrf.mxu1 }
  0xd2   :  { %v3544_v22 = vpop.f32.mrf.mxu0 }
  0xd3   :  { %v3546_v23 = vpop.f32.mrf.mxu1 }
  0xd4   :  { %v3548_v24 = vpop.f32.mrf.mxu0 }
  0xd5   :  { %v3552_v26 = vpop.f32.mrf.mxu1  ;;  %v294_v61 = vadd.f32 %v3542_v21, %v3548_v24 }
  0xd6   :  { %v3550_v25 = vpop.f32.mrf.mxu0 }
  0xd7   :  { %v3558_v29 = vpop.f32.mrf.mxu1 }
  0xd8   :  { %v3554_v27 = vpop.f32.mrf.mxu0 }
  0xd9   :  { %v3562_v31 = vpop.f32.mrf.mxu1  ;;  %v300_v11 = vadd.f32 %v3552_v26, %v3554_v27 }
  0xda   :  { %v3556_v28 = vpop.f32.mrf.mxu0 }
  0xdb   :  { %v3568_v34 = vpop.f32.mrf.mxu1 }
  0xdc   :  { %v3560_v30 = vpop.f32.mrf.mxu0 }
  0xdd   :  { %v3572_v37 = vpop.f32.mrf.mxu1 }
  0xde   :  { %v3564_v32 = vpop.f32.mrf.mxu0 }
  0xdf   :  { %v3574_v40 = vpop.f32.mrf.mxu1 }
  0xe0   :  { %v3566_v33 = vpop.f32.mrf.mxu0 }
  0xe1   :  { %v573_v43 = vpop.f32.mrf.mxu1 }
  0xe2   :  { %v3570_v35 = vpop.f32.mrf.mxu0 }
  0xe4   :  { %v281_v36 = vpop.f32.mrf.mxu0  ;;  %v3580_v46 = vpop.f32.mrf.mxu1 }
  0xe5   :  { %v282_v62 = vadd.f32 %v281_v36, %v156_v17  ;;  %v977_v17 = vld [vmem:[%s5110_s3 + $0x180] sm:$0xff]  ;;  %v292_v36 = vadd.f32 %v3538_v19, %v3544_v22  ;;  %v2624_v22 = vld [vmem:[%s5110_s3 + $0x368] sm:$0xff] }
  0xe6   :  { %v285_v38 = vpop.f32.mrf.mxu0  ;;  %v3584_v48 = vpop.f32.mrf.mxu1  ;;  %1252 = vmatpush2.msra.mxu0 %v977_v17  ;;  %v970_v17 = vld [vmem:[%s5110_s3 + $0x148] sm:$0xff] }
  0xe7   :  { %v286_v55 = vadd.f32 %v285_v38, %v3536_v18  ;;  %1253 = vmatprep.subr.mxu0 %v976_v53  ;;  %v774_v18 = vsub.s32 0, %v3606_v59  ;;  %v304_v53 = vadd.f32 %v3558_v29, %v3556_v28  ;;  %v2616_v29 = vld [vmem:[%s5110_s3 + $0x328] sm:$0xff]  ;;  %v2842_v59 = vld [vmem:[%s5112_s5 + $0xb8] sm:$0xff] }
  0xe8   :  { %v287_v39 = vpop.f32.mrf.mxu0  ;;  %v3590_v51 = vpop.f32.mrf.mxu1  ;;  %1254 = vmatpush2.msra.mxu0 %v975_v60 }
  0xe9   :  { %v288_v13 = vadd.f32 %v287_v39, %v3540_v20  ;;  %v3661_v20 = vrot.slane %v770_v14, %v778_v2  ;;  %v2625_v39 = vld [vmem:[%s5110_s3 + $0x370] sm:$0xff] }
  0xea   :  { %v3576_v41 = vpop.f32.mrf.mxu0  ;;  %v3602_v57 = vpop.f32.mrf.mxu1  ;;  %1153 = vmatpush2.msra.mxu1 %v2625_v39  ;;  %v969_v39 = vld [vmem:[%s5110_s3 + $0x140] sm:$0xff] }
  0xeb   :  { %1154 = vmatprep.subr.mxu1 %v2624_v22 }
  0xec   :  { %v421_v42 = vpop.f32.mrf.mxu0  ;;  %v3635_v9 = vpop.f32.mrf.mxu1 }
  0xed   :  { %v455_v5 = vadd.f32 %v421_v42, %v282_v62  ;;  %v280_v62 = vadd.f32 %v3570_v35, %v3534_v16  ;;  %v2622_v35 = vld [vmem:[%s5110_s3 + $0x358] sm:$0xff] }
  0xee   :  { %v3578_v44 = vpop.f32.mrf.mxu0  ;;  %v3680_v63 = vpop.f32.mrf.mxu1 }
  0xef   :  { %v607_v56 = vadd.f32 %v573_v43, %v455_v5  ;;  %v2623_v43 = vld [vmem:[%s5110_s3 + $0x360] sm:$0xff]  ;;  %v456_v21 = vadd.f32 %v3578_v44, %v286_v55  ;;  %v454_v3 = vadd.f32 %v3576_v41, %v280_v62  ;;  %v2621_v44 = vld [vmem:[%s5110_s3 + $0x350] sm:$0xff]  ;;  %v2620_v41 = vld [vmem:[%s5110_s3 + $0x348] sm:$0xff] }
  0xf0   :  { %v427_v45 = vpop.f32.mrf.mxu0  ;;  %1155 = vmatpush2.msra.mxu1 %v2623_v43  ;;  %v3717_v12 = vpop.f32.mrf.mxu1 }
  0xf1   :  { %v457_v19 = vadd.f32 %v427_v45, %v288_v13  ;;  %v974_v45 = vld [vmem:[%s5110_s3 + $0x168] sm:$0xff]  ;;  %1156 = vmatprep.subr.mxu1 %v2622_v35  ;;  %v964_v35 = vld [vmem:[%s5110_s3 + $0x118] sm:$0xff] }
  0xf2   :  { %v3582_v47 = vpop.f32.mrf.mxu0  ;;  %1255 = vmatprep.subr.mxu0 %v974_v45  ;;  %1157 = vmatpush2.msra.mxu1 %v2621_v44  ;;  %v2615_v45 = vld [vmem:[%s5110_s3 + $0x320] sm:$0xff] }
  0xf3   :  { %v458_v24 = vadd.f32 %v3582_v47, %v292_v36  ;;  %1256 = vmatpush2.msra.mxu0 %v973_v0  ;;  %v972_v47 = vld [vmem:[%s5110_s3 + $0x158] sm:$0xff]  ;;  %v609_v7 = vadd.f32 %v3584_v48, %v457_v19  ;;  %v3721_v48 = vrot.slane %v770_v14, %v774_v18  ;;  %1158 = vmatprep.subr.mxu1 %v2620_v41 }
  0xf4   :  { %v3586_v49 = vpop.f32.mrf.mxu0  ;;  %1257 = vmatprep.subr.mxu0 %v972_v47  ;;  %v608_v36 = vadd.f32 %v3580_v46, %v456_v21  ;;  %1159 = vmatpush2.msra.mxu1 %v2619_v15  ;;  %v2618_v14 = vld [vmem:[%s5110_s3 + $0x338] sm:$0xff]  ;;  %v606_v46 = vadd.f32 %v3574_v40, %v454_v3  ;;  %v967_v40 = vld [vmem:[%s5110_s3 + $0x130] sm:$0xff]  ;;  %v966_v21 = vld [vmem:[%s5110_s3 + $0x128] sm:$0xff] }
  0xf5   :  { %v459_v4 = vadd.f32 %v3586_v49, %v294_v61  ;;  %v971_v49 = vld [vmem:[%s5110_s3 + $0x150] sm:$0xff]  ;;  %v610_v26 = vadd.f32 %v3590_v51, %v458_v24  ;;  %1160 = vmatprep.subr.mxu1 %v2618_v14  ;;  %v968_v19 = vld [vmem:[%s5110_s3 + $0x138] sm:$0xff]  ;;  %v306_v61 = vadd.f32 %v3562_v31, %v3560_v30  ;;  %v965_v31 = vld [vmem:[%s5110_s3 + $0x120] sm:$0xff] }
  0xf6   :  { %v3588_v50 = vpop.f32.mrf.mxu0  ;;  %1258 = vmatpush2.msra.mxu0 %v971_v49  ;;  %v2614_v30 = vld [vmem:[%s5110_s3 + $0x318] sm:$0xff] }
  0xf7   :  { %v611_v51 = vadd.f32 %v3602_v57, %v459_v4  ;;  %1259 = vmatprep.subr.mxu0 %v970_v17  ;;  %v298_v57 = vadd.f32 %v3546_v23, %v3550_v25  ;;  %v312_v4 = vadd.f32 %v3572_v37, %v3566_v33  ;;  %v963_v33 = vld [vmem:[%s5110_s3 + $0x110] sm:$0xff]  ;;  %v2738_v14 = vld [vmem:[%s5110_s3 + $0x698] sm:$0xff] }
  0xf8   :  { %v3592_v52 = vpop.f32.mrf.mxu0  ;;  %1260 = vmatpush2.msra.mxu0 %v969_v39 }
  0xf9   :  { %v461_v62 = vadd.f32 %v3592_v52, %v300_v11  ;;  %1261 = vmatprep.subr.mxu0 %v968_v19  ;;  %v460_v52 = vadd.f32 %v3588_v50, %v298_v57  ;;  %v2611_v11 = vld [vmem:[%s5110_s3 + $0x300] sm:$0xff] }
  0xfa   :  { %v3594_v54 = vpop.f32.mrf.mxu0  ;;  %1262 = vmatpush2.msra.mxu0 %v967_v40 }
  0xfb   :  { %v462_v24 = vadd.f32 %v3594_v54, %v304_v53  ;;  %1263 = vmatprep.subr.mxu0 %v966_v21  ;;  %v613_v47 = vadd.f32 %v3680_v63, %v461_v62 }
  0xfc   :  { %v3604_v58 = vpop.f32.mrf.mxu0  ;;  %1264 = vmatpush2.msra.mxu0 %v965_v31 }
  0xfd   :  { %1265 = vmatprep.subr.mxu0 %v964_v35 }
  0xfe   :  { %v3620_v1 = vpop.f32.mrf.mxu0  ;;  %1266 = vmatpush2.msra.mxu0 %v963_v33 }
 0x100   :  { %v3637_v10 = vpop.f32.mrf.mxu0 }
 0x101   :  { %v465_v63 = vadd.f32 %v3637_v10, %v312_v4  ;;  %v961_v10 = vld [vmem:[%s5110_s3 + $0x100] sm:$0xff] }
 0x102   :  { %v3657_v42 = vpop.f32.mrf.mxu0 }
 0x103   :  { %v758_v23 = vadd.f32 %v3657_v42, %v606_v46  ;;  %v2613_v42 = vld [vmem:[%s5110_s3 + $0x310] sm:$0xff] }
 0x104   :  { %v725_v38 = vpop.f32.mrf.mxu0 }
 0x105   :  { %v759_v16 = vadd.f32 %v725_v38, %v607_v56  ;;  %v2617_v56 = vld [vmem:[%s5110_s3 + $0x330] sm:$0xff]  ;;  %v597_v38 = vpop.f32.mrf.mxu1  ;;  %v3803_v41 = vadd.f32 %v3721_v48, %v758_v23 }
 0x106   :  { %v729_v5 = vpop.f32.mrf.mxu0  ;;  %1161 = vmatpush2.msra.mxu1 %v2617_v56  ;;  %v2607_v56 = vld [vmem:[%s5110_s3 + $0x2e0] sm:$0xff] }
 0x107   :  { %v3707_v8 = vadd.f32 %v3661_v20, %v759_v16  ;;  %v760_v22 = vadd.f32 %v729_v5, %v608_v36  ;;  %1162 = vmatprep.subr.mxu1 %v2616_v29  ;;  %v463_v16 = vadd.f32 %v3604_v58, %v306_v61  ;;  %v310_v58 = vadd.f32 %v3568_v34, %v3564_v32  ;;  %v601_v5 = vpop.f32.mrf.mxu1  ;;  %v2612_v32 = vld [vmem:[%s5110_s3 + $0x308] sm:$0xff]  ;;  %v2674_v29 = vld [vmem:[%s5110_s3 + $0x4b8] sm:$0xff] }
 0x108   :  { %v731_v13 = vpop.f32.mrf.mxu0  ;;  %1163 = vmatpush2.msra.mxu1 %v2615_v45  ;;  %v612_v34 = vadd.f32 %v3635_v9, %v460_v52  ;;  %v2610_v9 = vld [vmem:[%s5110_s3 + $0x2f8] sm:$0xff] }
 0x109   :  { %v761_v27 = vadd.f32 %v731_v13, %v609_v7  ;;  %808 = vrot.lane.b32.xlu0 %v3707_v8, %s2986_s13  ;;  %v3788_v0 = vadd.f32 %v3721_v48, %v760_v22  ;;  %1164 = vmatprep.subr.mxu1 %v2614_v30  ;;  %v614_v7 = vadd.f32 %v3717_v12, %v462_v24  ;;  %v962_v12 = vld [vmem:[%s5110_s3 + $0x108] sm:$0xff]  ;;  %v603_v36 = vpop.f32.mrf.mxu1 }
 0x10a   :  { %v735_v55 = vpop.f32.mrf.mxu0  ;;  %1165 = vmatpush2.msra.mxu1 %v2613_v42  ;;  %v615_v37 = vadd.f32 %v597_v38, %v463_v16  ;;  %1267 = vmatprep.subr.mxu0 %v962_v12  ;;  %v464_v39 = vadd.f32 %v3620_v1, %v310_v58  ;;  %v617_v19 = vadd.f32 %v603_v36, %v465_v63 }
 0x10b   :  { %v3750_v60 = vadd.f32 %v3661_v20, %v761_v27  ;;  %v762_v28 = vadd.f32 %v735_v55, %v610_v26  ;;  %1166 = vmatprep.subr.mxu1 %v2612_v32  ;;  %v2944_v17 = vpack.i.bf16 %v3788_v0, %v3803_v41  ;;  %1268 = vmatpush2.msra.mxu0 %v961_v10  ;;  %v2609_v27 = vld [vmem:[%s5110_s3 + $0x2f0] sm:$0xff] }
 0x10c   :  { %v737_v43 = vpop.f32.mrf.mxu0  ;;  %1167 = vmatpush2.msra.mxu1 %v2611_v11  ;;  %1578 = vmatprep.subr.mxu0 %v2738_v14  ;;  %v616_v57 = vadd.f32 %v601_v5, %v464_v39 }
 0x10d   :  { %v763_v25 = vadd.f32 %v737_v43, %v611_v51  ;;  %812 = vrot.lane.b32.xlu0 %v3750_v60, %s2986_s13  ;;  %v3791_v3 = vadd.f32 %v3721_v48, %v762_v28  ;;  %1168 = vmatprep.subr.mxu1 %v2610_v9  ;;  %v2608_v51 = vld [vmem:[%s5110_s3 + $0x2e8] sm:$0xff] }
 0x10e   :  { %v741_v54 = vpop.f32.mrf.mxu0  ;;  %1169 = vmatpush2.msra.mxu1 %v2609_v27 }
 0x10f   :  { %v3794_v50 = vadd.f32 %v3661_v20, %v763_v25  ;;  %v764_v53 = vadd.f32 %v741_v54, %v612_v34  ;;  %1170 = vmatprep.subr.mxu1 %v2608_v51 }
 0x110   :  { %v743_v44 = vpop.f32.mrf.mxu0  ;;  %1171 = vmatpush2.msra.mxu1 %v2607_v56 }
 0x111   :  { %816 = vrot.lane.b32.xlu1 %v3794_v50, %s2986_s13  ;;  %814 = vrot.lane.b32.xlu0 %v3791_v3, %s2986_s13  ;;  %v765_v13 = vadd.f32 %v743_v44, %v613_v47  ;;  %v3854_v61 = vadd.f32 %v3721_v48, %v764_v53 }
 0x112   :  { %v747_v49 = vpop.f32.mrf.mxu0  ;;  %1387 = vmatprep.subr.mxu1 %v2674_v29 }
 0x113   :  { %v766_v15 = vadd.f32 %v747_v49, %v614_v7  ;;  %v789_v22 = vadd.f32 %v3661_v20, %v765_v13 }
 0x114   :  { %v749_v26 = vpop.f32.mrf.mxu0 }
 0x115   :  { %v767_v46 = vadd.f32 %v749_v26, %v615_v37  ;;  %2945 = vrot.lane.b32.xlu1 %v2944_v17, %s2986_s13  ;;  %v3847_v1 = vadd.f32 %v3721_v48, %v766_v15 }
 0x116   :  { %v753_v55 = vpop.f32.mrf.mxu0 }
 0x117   :  { %v791_v28 = vadd.f32 %v3661_v20, %v767_v46  ;;  %v768_v38 = vadd.f32 %v753_v55, %v616_v57  ;;  %v2949_v45 = vpack.i.bf16 %v3847_v1, %v3854_v61 }
 0x118   :  { %v755_v40 = vpop.f32.mrf.mxu0 }
 0x119   :  { %v769_v62 = vadd.f32 %v755_v40, %v617_v19  ;;  %824 = vrot.lane.b32.xlu0 %v791_v28, %s2986_s13  ;;  %820 = vrot.lane.b32.xlu1 %v789_v22, %s2986_s13  ;;  %v3867_v21 = vadd.f32 %v3721_v48, %v768_v38 }
 0x11b   :  { %v3859_v43 = vadd.f32 %v3661_v20, %v769_v62 }
 0x11d   :  { %2950 = vrot.lane.b32.xlu0 %v2949_v45, %s2986_s13  ;;  %828 = vrot.lane.b32.xlu1 %v3859_v43, %s2986_s13 }
 0x121   :  { %826 = vrot.lane.b32.xlu1 %v3867_v21, %s2986_s13 }
 0x17b   :  { %v809_v24 = vpop.permute.xlu0 %808 }
 0x17c   :  { %v850_v20 = vsel %vm849_vm2, %v809_v24, %v3707_v8 }
 0x17d   :  { %v857_v23 = vmax.f32 %v3707_v8, %v850_v20 }
 0x17f   :  { %v813_v25 = vpop.permute.xlu0 %812  ;;  %v888_v48 = vrot.slane %v857_v23, 1 }
 0x180   :  { %v851_v30 = vsel %vm849_vm2, %v813_v25, %v3750_v60 }
 0x181   :  { %v859_v31 = vmax.f32 %v3750_v60, %v851_v30 }
 0x183   :  { %v889_v52 = vrot.slane %v859_v31, 1  ;;  %v817_v16 = vpop.permute.xlu1 %816  ;;  %v815_v54 = vpop.permute.xlu0 %814 }
 0x184   :  { %v852_v42 = vsel %vm849_vm2, %v817_v16, %v3794_v50  ;;  %v833_v8 = vsel %vm830_vm4, %v815_v54, %v817_v16  ;;  %v2736_v16 = vld [vmem:[%s5110_s3 + $0x688] sm:$0xff] }
 0x185   :  { %v3880_v35 = vmax.f32 %v3794_v50, %v852_v42  ;;  %v890_v58 = vsel %vm884_vm3, %v888_v48, %v889_v52  ;;  %v3886_v44 = vmax.f32 %v3791_v3, %v833_v8 }
 0x186   :  { %v914_v4 = vmax.f32 %v857_v23, %v890_v58 }
 0x187   :  { %v893_v5 = vrot.slane %v3880_v35, 1  ;;  %v2946_v60 = vpop.permute.xlu1 %2945  ;;  %v3905_v17 = vrot.slane %v3886_v44, 1 }
 0x188   :  { %v2948_v47 = vunpack.i.h.bf16 %v2946_v60  ;;  %v2947_v7 = vunpack.i.l.bf16 %v2946_v60  ;;  %v3888_v32 = vmax.f32 %v914_v4, 0.0 }
 0x189   :  { %v894_v33 = vsel %vm884_vm3, %v889_v52, %v893_v5  ;;  %v3893_v50 = vsel %vm884_vm3, %v893_v5, %v3880_v35  ;;  %v994_v37 = vmax.f32 %v3880_v35, %v893_v5  ;;  %v993_v45 = vmax.f32 %v3886_v44, %v3905_v17 }
 0x18a   :  { %v916_v34 = vmax.f32 %v859_v31, %v894_v33  ;;  %v832_v63 = vsel %vm830_vm4, %v2948_v47, %v813_v25  ;;  %v831_v49 = vsel %vm830_vm4, %v2947_v7, %v809_v24  ;;  %2639 = vmatprep.mubr.msk.f32.mxu0 %vm1099_vm5, %v3888_v32  ;;  %v2737_v25 = vld [vmem:[%s5110_s3 + $0x690] sm:$0xff]  ;;  %v2734_v47 = vld [vmem:[%s5110_s3 + $0x678] sm:$0xff] }
 0x18b   :  { %v858_v3 = vmax.f32 %v3788_v0, %v832_v63  ;;  %v856_v11 = vmax.f32 %v3803_v41, %v831_v49  ;;  %v825_v12 = vpop.permute.xlu0 %824  ;;  %v821_v13 = vpop.permute.xlu1 %820  ;;  %v3911_v39 = vmax.f32 %v994_v37, 0.0  ;;  %v1017_v0 = vrot.slane %v3888_v32, 2  ;;  %v2673_v33 = vld [vmem:[%s5110_s3 + $0x4b0] sm:$0xff]  ;;  %v2672_v63 = vld [vmem:[%s5110_s3 + $0x4a8] sm:$0xff] }
 0x18c   :  { %v3902_v15 = vmax.f32 %v916_v34, 0.0  ;;  %v854_v9 = vsel %vm849_vm2, %v825_v12, %v791_v28  ;;  %v853_v10 = vsel %vm849_vm2, %v821_v13, %v789_v22  ;;  %v3974_v49 = vmax.f32 %v993_v45, 0.0 }
 0x18d   :  { %v886_v36 = vrot.slane %v858_v3, 1  ;;  %v885_v26 = vrot.slane %v856_v11, 1  ;;  %v3909_v27 = vmax.f32 %v791_v28, %v854_v9  ;;  %v863_v14 = vmax.f32 %v789_v22, %v853_v10  ;;  %v2671_v10 = vld [vmem:[%s5110_s3 + $0x4a0] sm:$0xff] }
 0x18e   :  { %v1018_v41 = vrot.slane %v3902_v15, 2  ;;  %v1022_v54 = vrot.slane %v3911_v39, 2 }
 0x18f   :  { %v892_v53 = vsel %vm884_vm3, %v886_v36, %v3905_v17  ;;  %v887_v46 = vsel %vm884_vm3, %v885_v26, %v886_v36  ;;  %v899_v51 = vrot.slane %v3909_v27, 1  ;;  %v898_v55 = vrot.slane %v863_v14, 1  ;;  %v2951_v56 = vpop.permute.xlu0 %2950  ;;  %v829_v19 = vpop.permute.xlu1 %828  ;;  %v2732_v36 = vld [vmem:[%s5110_s3 + $0x668] sm:$0xff] }
 0x190   :  { %v915_v28 = vmax.f32 %v858_v3, %v892_v53  ;;  %v913_v29 = vmax.f32 %v856_v11, %v887_v46  ;;  %v2953_v22 = vunpack.i.h.bf16 %v2951_v56  ;;  %v2952_v40 = vunpack.i.l.bf16 %v2951_v56  ;;  %v2731_v53 = vld [vmem:[%s5110_s3 + $0x660] sm:$0xff] }
 0x191   :  { %v900_v57 = vsel %vm884_vm3, %v898_v55, %v899_v51  ;;  %v855_v62 = vsel %vm849_vm2, %v829_v19, %v3859_v43  ;;  %v1019_v38 = vsel %vm1013_vm6, %v1017_v0, %v1018_v41  ;;  %v2730_v55 = vld [vmem:[%s5110_s3 + $0x658] sm:$0xff] }
 0x192   :  { %v3925_v24 = vmax.f32 %v915_v28, 0.0  ;;  %v3927_v20 = vmax.f32 %v913_v29, 0.0  ;;  %v835_v23 = vsel %vm830_vm4, %v2953_v22, %v825_v12  ;;  %2635 = vmatprep.mubr.msk.f32.mxu1 %vm1099_vm5, %v1019_v38  ;;  %v834_v31 = vsel %vm830_vm4, %v2952_v40, %v821_v13  ;;  %v2733_v13 = vld [vmem:[%s5110_s3 + $0x670] sm:$0xff] }
 0x193   :  { %v864_v30 = vmax.f32 %v3847_v1, %v835_v23  ;;  %v3937_v48 = vmax.f32 %v3859_v43, %v855_v62  ;;  %v827_v52 = vpop.permute.xlu1 %826  ;;  %v918_v42 = vmax.f32 %v863_v14, %v900_v57  ;;  %v862_v8 = vmax.f32 %v3854_v61, %v834_v31  ;;  %v2735_v1 = vld [vmem:[%s5110_s3 + $0x680] sm:$0xff]  ;;  %v2668_v57 = vld [vmem:[%s5110_s3 + $0x488] sm:$0xff]  ;;  %v2729_v62 = vld [vmem:[%s5110_s3 + $0x650] sm:$0xff] }
 0x194   :  { %v836_v58 = vsel %vm830_vm4, %v827_v52, %v829_v19  ;;  %1270 = vmatmul.mubr.f32.vlgmr.msra.gmra.mxu0 %v3927_v20  ;;  %v1014_v43 = vrot.slane %v3927_v20, 2  ;;  %v1015_v61 = vrot.slane %v3925_v24, 2  ;;  %v1023_v12 = vsel %vm1013_vm6, %v1018_v41, %v1022_v54  ;;  %v2670_v41 = vld [vmem:[%s5110_s3 + $0x498] sm:$0xff]  ;;  %v2669_v19 = vld [vmem:[%s5110_s3 + $0x490] sm:$0xff] }
 0x195   :  { %v896_v4 = vrot.slane %v864_v30, 1  ;;  %v3951_v5 = vrot.slane %v3937_v48, 1  ;;  %v3954_v60 = vmax.f32 %v3867_v21, %v836_v58  ;;  %1579 = vmatpush1.msra.mxu0 %v2737_v25  ;;  %2640 = vmatprep.mubr.msk.f32.mxu0 %vm1099_vm5, %v3902_v15  ;;  %v895_v7 = vrot.slane %v862_v8, 1  ;;  %v2667_v25 = vld [vmem:[%s5110_s3 + $0x480] sm:$0xff]  ;;  %v2666_v52 = vld [vmem:[%s5110_s3 + $0x478] sm:$0xff]  ;;  %v2665_v54 = vld [vmem:[%s5110_s3 + $0x470] sm:$0xff] }
 0x196   :  { %1580 = vmatprep.subr.mxu0 %v2736_v16  ;;  %v1016_v37 = vsel %vm1013_vm6, %v1014_v43, %v1015_v61  ;;  %v3976_v3 = vmax.f32 %v918_v42, 0.0  ;;  %v2727_v16 = vld [vmem:[%s5110_s3 + $0x640] sm:$0xff]  ;;  %v2726_v42 = vld [vmem:[%s5110_s3 + $0x638] sm:$0xff]  ;;  %v2664_v58 = vld [vmem:[%s5110_s3 + $0x468] sm:$0xff] }
 0x197   :  { %v904_v21 = vsel %vm884_vm3, %v899_v51, %v3951_v5  ;;  %v3968_v34 = vrot.slane %v3954_v60, 1  ;;  %1581 = vmatpush1.msra.mxu0 %v2735_v1  ;;  %1173 = vmatmul.mubr.f32.vlgmr.msra.gmra.mxu1 %v1016_v37  ;;  %v897_v9 = vsel %vm884_vm3, %v895_v7, %v896_v4  ;;  %v996_v0 = vmax.f32 %v3937_v48, %v3951_v5  ;;  %v2663_v7 = vld [vmem:[%s5110_s3 + $0x460] sm:$0xff] }
 0x198   :  { %v920_v11 = vmax.f32 %v3909_v27, %v904_v21  ;;  %1582 = vmatprep.subr.mxu0 %v2734_v47  ;;  %1388 = vmatpush1.msra.mxu1 %v2673_v33  ;;  %v917_v26 = vmax.f32 %v862_v8, %v897_v9  ;;  %v1020_v51 = vrot.slane %v3974_v49, 2  ;;  %v1027_v28 = vrot.slane %v3976_v3, 2  ;;  %v2724_v33 = vld [vmem:[%s5110_s3 + $0x628] sm:$0xff] }
 0x199   :  { %2636 = vmatprep.mubr.msk.f32.mxu1 %vm1099_vm5, %v1023_v12  ;;  %v902_v27 = vsel %vm884_vm3, %v896_v4, %v3968_v34  ;;  %1276 = vmatmul.mubr.f32.gmra.mxu0 %v3925_v24  ;;  %v4026_v38 = vmax.f32 %v996_v0, 0.0  ;;  %v995_v23 = vmax.f32 %v3954_v60, %v3968_v34  ;;  %v1489_v1 = vrot.slane %v3902_v15, 6  ;;  %v2725_v4 = vld [vmem:[%s5110_s3 + $0x630] sm:$0xff]  ;;  %v2662_v12 = vld [vmem:[%s5110_s3 + $0x458] sm:$0xff] }
 0x19a   :  { %v3993_v14 = vmax.f32 %v920_v11, 0.0  ;;  %1389 = vmatprep.subr.mxu1 %v2672_v63  ;;  %v919_v46 = vmax.f32 %v864_v30, %v902_v27  ;;  %1583 = vmatpush1.msra.mxu0 %v2733_v13  ;;  %v4010_v56 = vmax.f32 %v917_v26, 0.0  ;;  %v1021_v40 = vsel %vm1013_vm6, %v1015_v61, %v1020_v51  ;;  %v2728_v30 = vld [vmem:[%s5110_s3 + $0x648] sm:$0xff]  ;;  %v2723_v13 = vld [vmem:[%s5110_s3 + $0x620] sm:$0xff] }
 0x19b   :  { %2641 = vmatprep.mubr.msk.f32.mxu0 %vm1099_vm5, %v3976_v3  ;;  %1390 = vmatpush1.msra.mxu1 %v2671_v10  ;;  %v1032_v43 = vrot.slane %v4026_v38, 2  ;;  %v4064_v47 = vmax.f32 %v995_v23, 0.0  ;;  %v1488_v21 = vrot.slane %v3888_v32, 6  ;;  %v1688_v37 = vmax.f32 %v3880_v35, %v3893_v50  ;;  %v2661_v10 = vld [vmem:[%s5110_s3 + $0x450] sm:$0xff]  ;;  %v2720_v51 = vld [vmem:[%s5110_s3 + $0x608] sm:$0xff]  ;;  %v1963_v50 = vld [vmem:[%s5112_s5 + $0x78] sm:$0xff] }
 0x19c   :  { %1584 = vmatprep.subr.mxu0 %v2732_v36  ;;  %v1028_v29 = vrot.slane %v3993_v14, 2  ;;  %v4017_v22 = vmax.f32 %v919_v46, 0.0  ;;  %1391 = vmatprep.subr.mxu1 %v2670_v41  ;;  %v1024_v8 = vrot.slane %v4010_v56, 2  ;;  %v4089_v9 = vsel %vm884_vm3, %v3905_v17, %v3886_v44  ;;  %v2722_v36 = vld [vmem:[%s5110_s3 + $0x618] sm:$0xff]  ;;  %v2660_v41 = vld [vmem:[%s5110_s3 + $0x448] sm:$0xff]  ;;  %v2717_v23 = vld [vmem:[%s5110_s3 + $0x5f0] sm:$0xff] }
 0x19d   :  { %1585 = vmatpush1.msra.mxu0 %v2731_v53  ;;  %1179 = vmatmul.mubr.f32.gmra.mxu1 %v1021_v40  ;;  %v1490_v63 = vsel %vm1484_vm7, %v1488_v21, %v1489_v1  ;;  %v1030_v26 = vrot.slane %v4064_v47, 2  ;;  %v1687_v27 = vmax.f32 %v3886_v44, %v4089_v9  ;;  %v4103_v17 = vsel %vm884_vm3, %v3951_v5, %v3937_v48  ;;  %v2721_v53 = vld [vmem:[%s5110_s3 + $0x610] sm:$0xff]  ;;  %v2719_v40 = vld [vmem:[%s5110_s3 + $0x600] sm:$0xff]  ;;  %v2648_v21 = vld [vmem:[%s5110_s3 + $0x3e8] sm:$0xff] }
 0x19e   :  { %1586 = vmatprep.subr.mxu0 %v2730_v55  ;;  %v1029_v45 = vsel %vm1013_vm6, %v1027_v28, %v1028_v29  ;;  %1392 = vmatpush1.msra.mxu1 %v2669_v19  ;;  %v1025_v31 = vrot.slane %v4017_v22, 2  ;;  %v1033_v11 = vsel %vm1013_vm6, %v1028_v29, %v1032_v43  ;;  %v4108_v0 = vsel %vm884_vm3, %v3968_v34, %v3954_v60  ;;  %v2659_v55 = vld [vmem:[%s5110_s3 + $0x440] sm:$0xff]  ;;  %v2658_v29 = vld [vmem:[%s5110_s3 + $0x438] sm:$0xff]  ;;  %v2712_v43 = vld [vmem:[%s5110_s3 + $0x5c8] sm:$0xff] }
 0x19f   :  { %1282 = vmatmul.mubr.f32.gmra.mxu0 %v4010_v56  ;;  %1393 = vmatprep.subr.mxu1 %v2668_v57  ;;  %v1298_v5 = vrot.slane %v3902_v15, 4  ;;  %v1690_v46 = vmax.f32 %v3937_v48, %v4103_v17  ;;  %v1689_v34 = vmax.f32 %v3954_v60, %v4108_v0  ;;  %v1297_v19 = vrot.slane %v3888_v32, 4  ;;  %v2657_v32 = vld [vmem:[%s5110_s3 + $0x430] sm:$0xff]  ;;  %v2854_v44 = vld [vmem:[%s5112_s5 + $0x118] sm:$0xff]  ;;  %v2852_v60 = vld [vmem:[%s5112_s5 + $0x108] sm:$0xff] }
 0x1a0   :  { %1587 = vmatpush1.msra.mxu0 %v2729_v62  ;;  %2637 = vmatprep.mubr.msk.f32.mxu1 %vm1099_vm5, %v1029_v45  ;;  %v1026_v61 = vsel %vm1013_vm6, %v1024_v8, %v1025_v31  ;;  %v1031_v28 = vsel %vm1013_vm6, %v1025_v31, %v1030_v26  ;;  %v2718_v62 = vld [vmem:[%s5110_s3 + $0x5f8] sm:$0xff]  ;;  %v2656_v45 = vld [vmem:[%s5110_s3 + $0x428] sm:$0xff]  ;;  %v2713_v8 = vld [vmem:[%s5110_s3 + $0x5d0] sm:$0xff] }
 0x1a1   :  { %2642 = vmatprep.mubr.msk.f32.mxu0 %vm1099_vm5, %v3993_v14  ;;  %1394 = vmatpush1.msra.mxu1 %v2667_v25  ;;  %v1299_v57 = vsel %vm81_vm0, %v1297_v19, %v1298_v5  ;;  %v2655_v25 = vld [vmem:[%s5110_s3 + $0x420] sm:$0xff]  ;;  %v2654_v31 = vld [vmem:[%s5110_s3 + $0x418] sm:$0xff]  ;;  %v1693_v35 = vmax.f32 %v1689_v34, 0.0  ;;  %v1962_v48 = vld [vmem:[%s5112_s5 + $0x70] sm:$0xff] }
 0x1a2   :  { %1588 = vmatprep.subr.mxu0 %v2728_v30  ;;  %1395 = vmatprep.subr.mxu1 %v2666_v52  ;;  %v2716_v30 = vld [vmem:[%s5110_s3 + $0x5e8] sm:$0xff]  ;;  %v2715_v52 = vld [vmem:[%s5110_s3 + $0x5e0] sm:$0xff]  ;;  %v2766_v26 = vld [vmem:[%s5110_s3 + $0x778] sm:$0xff] }
 0x1a3   :  { %1589 = vmatpush1.msra.mxu0 %v2727_v16  ;;  %1396 = vmatpush1.msra.mxu1 %v2665_v54  ;;  %v2653_v16 = vld [vmem:[%s5110_s3 + $0x410] sm:$0xff]  ;;  %v2714_v54 = vld [vmem:[%s5110_s3 + $0x5d8] sm:$0xff]  ;;  %v1957_v34 = vld [vmem:[%s5112_s5 + $0x48] sm:$0xff] }
 0x1a4   :  { %1590 = vmatprep.subr.mxu0 %v2726_v42  ;;  %1288 = vmatmul.mubr.f32.gmra.mxu0 %v4017_v22  ;;  %v2652_v42 = vld [vmem:[%s5110_s3 + $0x408] sm:$0xff]  ;;  %v2702_v19 = vld [vmem:[%s5110_s3 + $0x598] sm:$0xff]  ;;  %v2849_v17 = vld [vmem:[%s5112_s5 + $0xf0] sm:$0xff] }
 0x1a5   :  { %1397 = vmatprep.subr.mxu1 %v2664_v58  ;;  %1591 = vmatpush1.msra.mxu0 %v2725_v4  ;;  %v2651_v58 = vld [vmem:[%s5110_s3 + $0x400] sm:$0xff]  ;;  %v2650_v4 = vld [vmem:[%s5110_s3 + $0x3f8] sm:$0xff]  ;;  %v1958_v0 = vld [vmem:[%s5112_s5 + $0x50] sm:$0xff] }
 0x1a6   :  { %1185 = vmatmul.mubr.f32.gmra.mxu1 %v1026_v61  ;;  %1592 = vmatprep.subr.mxu0 %v2724_v33  ;;  %v2711_v61 = vld [vmem:[%s5110_s3 + $0x5c0] sm:$0xff]  ;;  %v2710_v33 = vld [vmem:[%s5110_s3 + $0x5b8] sm:$0xff] }
 0x1a7   :  { %1398 = vmatpush1.msra.mxu1 %v2663_v7  ;;  %2767 = vmatprep.mubr.msk.f32.mxu0 %vm1099_vm5, %v1490_v63  ;;  %v2649_v7 = vld [vmem:[%s5110_s3 + $0x3f0] sm:$0xff]  ;;  %v2850_v9 = vld [vmem:[%s5112_s5 + $0xf8] sm:$0xff] }
 0x1a8   :  { %2638 = vmatprep.mubr.msk.f32.mxu1 %vm1099_vm5, %v1033_v11  ;;  %1399 = vmatprep.subr.mxu1 %v2662_v12  ;;  %v2709_v63 = vld [vmem:[%s5110_s3 + $0x5b0] sm:$0xff]  ;;  %v2647_v11 = vld [vmem:[%s5110_s3 + $0x3e0] sm:$0xff]  ;;  %v2708_v12 = vld [vmem:[%s5110_s3 + $0x5a8] sm:$0xff] }
 0x1a9   :  { %1593 = vmatpush1.msra.mxu0 %v2723_v13  ;;  %1400 = vmatpush1.msra.mxu1 %v2661_v10  ;;  %v2646_v13 = vld [vmem:[%s5110_s3 + $0x3d8] sm:$0xff]  ;;  %v2707_v10 = vld [vmem:[%s5110_s3 + $0x5a0] sm:$0xff] }
 0x1aa   :  { %1594 = vmatprep.subr.mxu0 %v2722_v36  ;;  %1401 = vmatprep.subr.mxu1 %v2660_v41  ;;  %v2645_v36 = vld [vmem:[%s5110_s3 + $0x3d0] sm:$0xff]  ;;  %v2644_v41 = vld [vmem:[%s5110_s3 + $0x3c8] sm:$0xff] }
 0x1ab   :  { %1595 = vmatpush1.msra.mxu0 %v2721_v53  ;;  %1191 = vmatmul.mubr.f32.gmra.mxu1 %v1031_v28  ;;  %v2765_v53 = vld [vmem:[%s5110_s3 + $0x770] sm:$0xff]  ;;  %v2763_v28 = vld [vmem:[%s5110_s3 + $0x760] sm:$0xff] }
 0x1ac   :  { %1596 = vmatprep.subr.mxu0 %v2720_v51  ;;  %1402 = vmatpush1.msra.mxu1 %v2659_v55  ;;  %v2643_v51 = vld [vmem:[%s5110_s3 + $0x3c0] sm:$0xff]  ;;  %v2764_v55 = vld [vmem:[%s5110_s3 + $0x768] sm:$0xff] }
 0x1ad   :  { %2703 = vmatprep.mubr.msk.f32.mxu1 %vm1099_vm5, %v1299_v57  ;;  %1403 = vmatprep.subr.mxu1 %v2658_v29  ;;  %v2701_v29 = vld [vmem:[%s5110_s3 + $0x590] sm:$0xff]  ;;  %v2700_v57 = vld [vmem:[%s5110_s3 + $0x588] sm:$0xff] }
 0x1ae   :  { %1597 = vmatpush1.msra.mxu0 %v2719_v40  ;;  %1404 = vmatpush1.msra.mxu1 %v2657_v32  ;;  %v2762_v40 = vld [vmem:[%s5110_s3 + $0x758] sm:$0xff]  ;;  %v2761_v32 = vld [vmem:[%s5110_s3 + $0x750] sm:$0xff] }
 0x1af   :  { %1598 = vmatprep.subr.mxu0 %v2718_v62  ;;  %1405 = vmatprep.subr.mxu1 %v2656_v45  ;;  %v2699_v62 = vld [vmem:[%s5110_s3 + $0x580] sm:$0xff]  ;;  %v2760_v45 = vld [vmem:[%s5110_s3 + $0x748] sm:$0xff] }
 0x1b0   :  { %1599 = vmatpush1.msra.mxu0 %v2717_v23  ;;  %1406 = vmatpush1.msra.mxu1 %v2655_v25  ;;  %v2698_v23 = vld [vmem:[%s5110_s3 + $0x578] sm:$0xff]  ;;  %v2759_v25 = vld [vmem:[%s5110_s3 + $0x740] sm:$0xff] }
 0x1b1   :  { %1600 = vmatprep.subr.mxu0 %v2716_v30  ;;  %1407 = vmatprep.subr.mxu1 %v2654_v31  ;;  %v2697_v30 = vld [vmem:[%s5110_s3 + $0x570] sm:$0xff]  ;;  %v2758_v31 = vld [vmem:[%s5110_s3 + $0x738] sm:$0xff] }
 0x1b2   :  { %1601 = vmatpush1.msra.mxu0 %v2715_v52  ;;  %1408 = vmatpush1.msra.mxu1 %v2653_v16  ;;  %v2696_v52 = vld [vmem:[%s5110_s3 + $0x568] sm:$0xff]  ;;  %v2757_v16 = vld [vmem:[%s5110_s3 + $0x730] sm:$0xff] }
 0x1b3   :  { %1602 = vmatprep.subr.mxu0 %v2714_v54  ;;  %1409 = vmatprep.subr.mxu1 %v2652_v42  ;;  %v2695_v54 = vld [vmem:[%s5110_s3 + $0x560] sm:$0xff]  ;;  %v2756_v42 = vld [vmem:[%s5110_s3 + $0x728] sm:$0xff] }
 0x1b4   :  { %1603 = vmatpush1.msra.mxu0 %v2713_v8  ;;  %1410 = vmatpush1.msra.mxu1 %v2651_v58  ;;  %v2694_v8 = vld [vmem:[%s5110_s3 + $0x558] sm:$0xff]  ;;  %v2755_v58 = vld [vmem:[%s5110_s3 + $0x720] sm:$0xff] }
 0x1b5   :  { %1604 = vmatprep.subr.mxu0 %v2712_v43  ;;  %1411 = vmatprep.subr.mxu1 %v2650_v4  ;;  %v2693_v43 = vld [vmem:[%s5110_s3 + $0x550] sm:$0xff]  ;;  %v2754_v4 = vld [vmem:[%s5110_s3 + $0x718] sm:$0xff] }
 0x1b6   :  { %1605 = vmatpush1.msra.mxu0 %v2711_v61  ;;  %1412 = vmatpush1.msra.mxu1 %v2649_v7  ;;  %v2692_v61 = vld [vmem:[%s5110_s3 + $0x548] sm:$0xff]  ;;  %v2753_v7 = vld [vmem:[%s5110_s3 + $0x710] sm:$0xff] }
 0x1b7   :  { %1606 = vmatprep.subr.mxu0 %v2710_v33  ;;  %1413 = vmatprep.subr.mxu1 %v2648_v21  ;;  %v2691_v33 = vld [vmem:[%s5110_s3 + $0x540] sm:$0xff]  ;;  %v2752_v21 = vld [vmem:[%s5110_s3 + $0x708] sm:$0xff] }
 0x1b8   :  { %1607 = vmatpush1.msra.mxu0 %v2709_v63  ;;  %1414 = vmatpush1.msra.mxu1 %v2647_v11  ;;  %v2690_v63 = vld [vmem:[%s5110_s3 + $0x538] sm:$0xff]  ;;  %v2751_v11 = vld [vmem:[%s5110_s3 + $0x700] sm:$0xff] }
 0x1b9   :  { %1608 = vmatprep.subr.mxu0 %v2708_v12  ;;  %1415 = vmatprep.subr.mxu1 %v2646_v13  ;;  %v2689_v12 = vld [vmem:[%s5110_s3 + $0x530] sm:$0xff]  ;;  %v2750_v13 = vld [vmem:[%s5110_s3 + $0x6f8] sm:$0xff] }
 0x1ba   :  { %1609 = vmatpush1.msra.mxu0 %v2707_v10  ;;  %1416 = vmatpush1.msra.mxu1 %v2645_v36  ;;  %v2688_v10 = vld [vmem:[%s5110_s3 + $0x528] sm:$0xff]  ;;  %v2749_v36 = vld [vmem:[%s5110_s3 + $0x6f0] sm:$0xff] }
 0x1bb   :  { %1614 = vmatprep.subr.mxu0 %v2766_v26  ;;  %1417 = vmatprep.subr.mxu1 %v2644_v41  ;;  %v2687_v26 = vld [vmem:[%s5110_s3 + $0x520] sm:$0xff]  ;;  %v2748_v41 = vld [vmem:[%s5110_s3 + $0x6e8] sm:$0xff] }
 0x1bc   :  { %1615 = vmatpush2.msra.mxu0 %v2765_v53  ;;  %1418 = vmatpush1.msra.mxu1 %v2643_v51  ;;  %v2686_v53 = vld [vmem:[%s5110_s3 + $0x518] sm:$0xff]  ;;  %v2747_v51 = vld [vmem:[%s5110_s3 + $0x6e0] sm:$0xff] }
 0x1bd   :  { %1616 = vmatprep.subr.mxu0 %v2764_v55  ;;  %1423 = vmatprep.subr.mxu1 %v2702_v19  ;;  %v2685_v55 = vld [vmem:[%s5110_s3 + $0x510] sm:$0xff]  ;;  %v2746_v19 = vld [vmem:[%s5110_s3 + $0x6d8] sm:$0xff] }
 0x1be   :  { %1617 = vmatpush2.msra.mxu0 %v2763_v28  ;;  %1424 = vmatpush2.msra.mxu1 %v2701_v29  ;;  %v2684_v28 = vld [vmem:[%s5110_s3 + $0x508] sm:$0xff]  ;;  %v2745_v29 = vld [vmem:[%s5110_s3 + $0x6d0] sm:$0xff] }
 0x1bf   :  { %1618 = vmatprep.subr.mxu0 %v2762_v40  ;;  %1425 = vmatprep.subr.mxu1 %v2700_v57  ;;  %v2683_v40 = vld [vmem:[%s5110_s3 + $0x500] sm:$0xff]  ;;  %v2744_v57 = vld [vmem:[%s5110_s3 + $0x6c8] sm:$0xff] }
 0x1c0   :  { %1619 = vmatpush2.msra.mxu0 %v2761_v32  ;;  %1426 = vmatpush2.msra.mxu1 %v2699_v62  ;;  %v2682_v32 = vld [vmem:[%s5110_s3 + $0x4f8] sm:$0xff]  ;;  %v2743_v62 = vld [vmem:[%s5110_s3 + $0x6c0] sm:$0xff] }
 0x1c1   :  { %1620 = vmatprep.subr.mxu0 %v2760_v45  ;;  %1427 = vmatprep.subr.mxu1 %v2698_v23  ;;  %v2681_v45 = vld [vmem:[%s5110_s3 + $0x4f0] sm:$0xff]  ;;  %v2742_v23 = vld [vmem:[%s5110_s3 + $0x6b8] sm:$0xff] }
 0x1c2   :  { %1621 = vmatpush2.msra.mxu0 %v2759_v25  ;;  %1428 = vmatpush2.msra.mxu1 %v2697_v30  ;;  %v2680_v25 = vld [vmem:[%s5110_s3 + $0x4e8] sm:$0xff]  ;;  %v2741_v30 = vld [vmem:[%s5110_s3 + $0x6b0] sm:$0xff] }
 0x1c3   :  { %1622 = vmatprep.subr.mxu0 %v2758_v31  ;;  %1429 = vmatprep.subr.mxu1 %v2696_v52  ;;  %v2679_v31 = vld [vmem:[%s5110_s3 + $0x4e0] sm:$0xff]  ;;  %v2740_v52 = vld [vmem:[%s5110_s3 + $0x6a8] sm:$0xff] }
 0x1c4   :  { %1623 = vmatpush2.msra.mxu0 %v2757_v16  ;;  %1430 = vmatpush2.msra.mxu1 %v2695_v54  ;;  %v1485_v16 = vrot.slane %v3927_v20, 6  ;;  %v1486_v54 = vrot.slane %v3925_v24, 6 }
 0x1c5   :  { %1624 = vmatprep.subr.mxu0 %v2756_v42  ;;  %1431 = vmatprep.subr.mxu1 %v2694_v8  ;;  %v2678_v42 = vld [vmem:[%s5110_s3 + $0x4d8] sm:$0xff]  ;;  %v2739_v8 = vld [vmem:[%s5110_s3 + $0x6a0] sm:$0xff] }
 0x1c6   :  { %1625 = vmatpush2.msra.mxu0 %v2755_v58  ;;  %1432 = vmatpush2.msra.mxu1 %v2693_v43  ;;  %v1493_v58 = vrot.slane %v3911_v39, 6  ;;  %v2677_v43 = vld [vmem:[%s5110_s3 + $0x4d0] sm:$0xff] }
 0x1c7   :  { %1626 = vmatprep.subr.mxu0 %v2754_v4  ;;  %1433 = vmatprep.subr.mxu1 %v2692_v61  ;;  %v2676_v4 = vld [vmem:[%s5110_s3 + $0x4c8] sm:$0xff]  ;;  %v1294_v61 = vrot.slane %v3927_v20, 4  ;;  %v2806_v20 = vld [vmem:[%s5110_s3 + $0x878] sm:$0xff] }
 0x1c8   :  { %1627 = vmatpush2.msra.mxu0 %v2753_v7  ;;  %1434 = vmatpush2.msra.mxu1 %v2691_v33  ;;  %v1295_v7 = vrot.slane %v3925_v24, 4  ;;  %v1487_v33 = vsel %vm1484_vm7, %v1485_v16, %v1486_v54  ;;  %v1304_v16 = vrot.slane %v4010_v56, 4 }
 0x1c9   :  { %1628 = vmatprep.subr.mxu0 %v2752_v21  ;;  %1435 = vmatprep.subr.mxu1 %v2690_v63  ;;  %v2675_v21 = vld [vmem:[%s5110_s3 + $0x4c0] sm:$0xff]  ;;  %v1302_v63 = vrot.slane %v3911_v39, 4 }
 0x1ca   :  { %1629 = vmatpush2.msra.mxu0 %v2751_v11  ;;  %1436 = vmatpush2.msra.mxu1 %v2689_v12  ;;  %v1494_v11 = vsel %vm1484_vm7, %v1489_v1, %v1493_v58  ;;  %v1499_v12 = vrot.slane %v3993_v14, 6  ;;  %v1296_v39 = vsel %vm81_vm0, %v1294_v61, %v1295_v7  ;;  %v1498_v1 = vrot.slane %v3976_v3, 6  ;;  %v2794_v61 = vld [vmem:[%s5110_s3 + $0x818] sm:$0xff] }
 0x1cb   :  { %1630 = vmatprep.subr.mxu0 %v2750_v13  ;;  %1437 = vmatprep.subr.mxu1 %v2688_v10  ;;  %v1491_v13 = vrot.slane %v3974_v49, 6  ;;  %v2805_v10 = vld [vmem:[%s5110_s3 + $0x870] sm:$0xff] }
 0x1cc   :  { %1631 = vmatpush2.msra.mxu0 %v2749_v36  ;;  %1438 = vmatpush2.msra.mxu1 %v2687_v26  ;;  %v1303_v36 = vsel %vm81_vm0, %v1298_v5, %v1302_v63  ;;  %v1300_v5 = vrot.slane %v3974_v49, 4  ;;  %v2790_v63 = vld [vmem:[%s5110_s3 + $0x7f8] sm:$0xff] }
 0x1cd   :  { %1632 = vmatprep.subr.mxu0 %v2748_v41  ;;  %1439 = vmatprep.subr.mxu1 %v2686_v53  ;;  %v1492_v26 = vsel %vm1484_vm7, %v1486_v54, %v1491_v13  ;;  %v2804_v41 = vld [vmem:[%s5110_s3 + $0x868] sm:$0xff]  ;;  %v1500_v53 = vsel %vm1484_vm7, %v1498_v1, %v1499_v12  ;;  %v2798_v54 = vld [vmem:[%s5110_s3 + $0x838] sm:$0xff]  ;;  %v2785_v13 = vld [vmem:[%s5110_s3 + $0x7d0] sm:$0xff] }
 0x1ce   :  { %1633 = vmatpush2.msra.mxu0 %v2747_v51  ;;  %1440 = vmatpush2.msra.mxu1 %v2685_v55  ;;  %v2803_v51 = vld [vmem:[%s5110_s3 + $0x860] sm:$0xff]  ;;  %v1308_v55 = vrot.slane %v3993_v14, 4  ;;  %v2782_v1 = vld [vmem:[%s5110_s3 + $0x7b8] sm:$0xff] }
 0x1cf   :  { %1634 = vmatprep.subr.mxu0 %v2746_v19  ;;  %1441 = vmatprep.subr.mxu1 %v2684_v28  ;;  %v1496_v19 = vrot.slane %v4017_v22, 6  ;;  %v2802_v28 = vld [vmem:[%s5110_s3 + $0x858] sm:$0xff] }
 0x1d0   :  { %1635 = vmatpush2.msra.mxu0 %v2745_v29  ;;  %1442 = vmatpush2.msra.mxu1 %v2683_v40  ;;  %v1503_v29 = vrot.slane %v4026_v38, 6  ;;  %v1307_v40 = vrot.slane %v3976_v3, 4  ;;  %v1305_v3 = vrot.slane %v4017_v22, 4 }
 0x1d1   :  { %1636 = vmatprep.subr.mxu0 %v2744_v57  ;;  %1443 = vmatprep.subr.mxu1 %v2682_v32  ;;  %v1495_v57 = vrot.slane %v4010_v56, 6  ;;  %v1301_v32 = vsel %vm81_vm0, %v1295_v7, %v1300_v5  ;;  %v2796_v56 = vld [vmem:[%s5110_s3 + $0x828] sm:$0xff]  ;;  %v2793_v7 = vld [vmem:[%s5110_s3 + $0x810] sm:$0xff]  ;;  %v2834_v5 = vld [vmem:[%s5110_s3 + $0x958] sm:$0xff] }
 0x1d2   :  { %1637 = vmatpush2.msra.mxu0 %v2743_v62  ;;  %1444 = vmatpush2.msra.mxu1 %v2681_v45  ;;  %v2801_v62 = vld [vmem:[%s5110_s3 + $0x850] sm:$0xff]  ;;  %v1309_v49 = vsel %vm81_vm0, %v1307_v40, %v1308_v55  ;;  %v2831_v40 = vld [vmem:[%s5110_s3 + $0x940] sm:$0xff] }
 0x1d3   :  { %1638 = vmatprep.subr.mxu0 %v2742_v23  ;;  %1445 = vmatprep.subr.mxu1 %v2680_v25  ;;  %v1497_v45 = vsel %vm1484_vm7, %v1495_v57, %v1496_v19  ;;  %v2800_v23 = vld [vmem:[%s5110_s3 + $0x848] sm:$0xff]  ;;  %v1504_v25 = vsel %vm1484_vm7, %v1499_v12, %v1503_v29  ;;  %v2787_v12 = vld [vmem:[%s5110_s3 + $0x7e0] sm:$0xff]  ;;  %v2830_v57 = vld [vmem:[%s5110_s3 + $0x938] sm:$0xff] }
 0x1d4   :  { %1639 = vmatpush2.msra.mxu0 %v2741_v30  ;;  %1446 = vmatpush2.msra.mxu1 %v2679_v31  ;;  %v2799_v30 = vld [vmem:[%s5110_s3 + $0x840] sm:$0xff]  ;;  %v1312_v31 = vrot.slane %v4026_v38, 4  ;;  %v2832_v29 = vld [vmem:[%s5110_s3 + $0x948] sm:$0xff] }
 0x1d5   :  { %1640 = vmatprep.subr.mxu0 %v2740_v52  ;;  %1447 = vmatprep.subr.mxu1 %v2678_v42  ;;  %v1501_v52 = vrot.slane %v4064_v47, 6  ;;  %v1306_v42 = vsel %vm81_vm0, %v1304_v16, %v1305_v3  ;;  %v2819_v16 = vld [vmem:[%s5110_s3 + $0x8e0] sm:$0xff] }
 0x1d6   :  { %1641 = vmatpush2.msra.mxu0 %v2739_v8  ;;  %1448 = vmatpush2.msra.mxu1 %v2677_v43  ;;  %v2797_v8 = vld [vmem:[%s5110_s3 + $0x830] sm:$0xff]  ;;  %v1313_v38 = vsel %vm81_vm0, %v1308_v55, %v1312_v31  ;;  %v1310_v43 = vrot.slane %v4064_v47, 4  ;;  %v2776_v55 = vld [vmem:[%s5110_s3 + $0x788] sm:$0xff] }
 0x1d7   :  { %1643 = vmatmul.mubr.f32.vlgmr.msra.gmra.mxu0 %v1487_v33  ;;  %1449 = vmatprep.subr.mxu1 %v2676_v4  ;;  %v1502_v58 = vsel %vm1484_vm7, %v1496_v19, %v1501_v52  ;;  %v2795_v4 = vld [vmem:[%s5110_s3 + $0x820] sm:$0xff]  ;;  %v2792_v33 = vld [vmem:[%s5110_s3 + $0x808] sm:$0xff]  ;;  %v2821_v31 = vld [vmem:[%s5110_s3 + $0x8f0] sm:$0xff] }
 0x1d8   :  { %2768 = vmatprep.mubr.msk.f32.mxu0 %vm1099_vm5, %v1494_v11  ;;  %1450 = vmatpush2.msra.mxu1 %v2675_v21  ;;  %v1311_v47 = vsel %vm81_vm0, %v1305_v3, %v1310_v43  ;;  %v2791_v21 = vld [vmem:[%s5110_s3 + $0x800] sm:$0xff]  ;;  %v2789_v11 = vld [vmem:[%s5110_s3 + $0x7f0] sm:$0xff]  ;;  %v2824_v3 = vld [vmem:[%s5110_s3 + $0x908] sm:$0xff] }
 0x1d9   :  { %2004 = vmatprep.subr.mxu0 %v2985_v6  ;;  %1452 = vmatmul.mubr.f32.vlgmr.msra.gmra.mxu1 %v1296_v39  ;;  %v2784_v39 = vld [vmem:[%s5110_s3 + $0x7c8] sm:$0xff]  ;;  %v2775_v19 = vld [vmem:[%s5110_s3 + $0x780] sm:$0xff] }
 0x1da   :  { %1762 = vmatprep.subr.mxu1 %v2806_v20  ;;  %2704 = vmatprep.mubr.msk.f32.mxu1 %vm1099_vm5, %v1303_v36  ;;  %v2788_v20 = vld [vmem:[%s5110_s3 + $0x7e8] sm:$0xff]  ;;  %v2781_v36 = vld [vmem:[%s5110_s3 + $0x7b0] sm:$0xff] }
 0x1db   :  { %1649 = vmatmul.mubr.f32.gmra.mxu0 %v1492_v26  ;;  %1763 = vmatpush1.msra.mxu1 %v2805_v10  ;;  %v2783_v10 = vld [vmem:[%s5110_s3 + $0x7c0] sm:$0xff]  ;;  %v2780_v26 = vld [vmem:[%s5110_s3 + $0x7a8] sm:$0xff] }
 0x1dc   :  { %2769 = vmatprep.mubr.msk.f32.mxu0 %vm1099_vm5, %v1500_v53  ;;  %1764 = vmatprep.subr.mxu1 %v2804_v41  ;;  %v2779_v41 = vld [vmem:[%s5110_s3 + $0x7a0] sm:$0xff]  ;;  %v2778_v53 = vld [vmem:[%s5110_s3 + $0x798] sm:$0xff]  ;;  %v2820_v52 = vld [vmem:[%s5110_s3 + $0x8e8] sm:$0xff] }
 0x1dd   :  { %1765 = vmatpush1.msra.mxu1 %v2803_v51  ;;  %v2777_v51 = vld [vmem:[%s5110_s3 + $0x790] sm:$0xff]  ;;  %v2812_v43 = vld [vmem:[%s5110_s3 + $0x8a8] sm:$0xff]  ;;  %2005 = vmatpush1.msra.mxu0 %v2854_v44 }
 0x1de   :  { %1458 = vmatmul.mubr.f32.gmra.mxu1 %v1301_v32  ;;  %1766 = vmatprep.subr.mxu1 %v2802_v28  ;;  %v2833_v28 = vld [vmem:[%s5110_s3 + $0x950] sm:$0xff] }
 0x1df   :  { %2705 = vmatprep.mubr.msk.f32.mxu1 %vm1099_vm5, %v1309_v49  ;;  %1655 = vmatmul.mubr.f32.gmra.mxu0 %v1497_v45  ;;  %v2829_v32 = vld [vmem:[%s5110_s3 + $0x930] sm:$0xff]  ;;  %v2827_v49 = vld [vmem:[%s5110_s3 + $0x920] sm:$0xff]  ;;  %v2826_v45 = vld [vmem:[%s5110_s3 + $0x918] sm:$0xff] }
 0x1e0   :  { %1767 = vmatpush1.msra.mxu1 %v2801_v62  ;;  %2770 = vmatprep.mubr.msk.f32.mxu0 %vm1099_vm5, %v1504_v25  ;;  %v2828_v62 = vld [vmem:[%s5110_s3 + $0x928] sm:$0xff]  ;;  %v2823_v25 = vld [vmem:[%s5110_s3 + $0x900] sm:$0xff]  ;;  %v2845_v44 = vld [vmem:[%s5112_s5 + $0xd0] sm:$0xff] }
 0x1e1   :  { %1768 = vmatprep.subr.mxu1 %v2800_v23  ;;  %v2825_v23 = vld [vmem:[%s5110_s3 + $0x910] sm:$0xff]  ;;  %2006 = vmatprep.subr.mxu0 %v2985_v6 }
 0x1e2   :  { %1769 = vmatpush1.msra.mxu1 %v2799_v30  ;;  %v2822_v30 = vld [vmem:[%s5110_s3 + $0x8f8] sm:$0xff] }
 0x1e3   :  { %1464 = vmatmul.mubr.f32.gmra.mxu1 %v1306_v42  ;;  %1770 = vmatprep.subr.mxu1 %v2798_v54  ;;  %v2818_v54 = vld [vmem:[%s5110_s3 + $0x8d8] sm:$0xff]  ;;  %v2817_v42 = vld [vmem:[%s5110_s3 + $0x8d0] sm:$0xff] }
 0x1e4   :  { %2706 = vmatprep.mubr.msk.f32.mxu1 %vm1099_vm5, %v1313_v38  ;;  %1661 = vmatmul.mubr.f32.gmra.mxu0 %v1502_v58  ;;  %v2815_v38 = vld [vmem:[%s5110_s3 + $0x8c0] sm:$0xff]  ;;  %v2814_v58 = vld [vmem:[%s5110_s3 + $0x8b8] sm:$0xff] }
 0x1e5   :  { %1771 = vmatpush1.msra.mxu1 %v2797_v8  ;;  %v2816_v8 = vld [vmem:[%s5110_s3 + $0x8c8] sm:$0xff] }
 0x1e6   :  { %1772 = vmatprep.subr.mxu1 %v2796_v56  ;;  %v2813_v56 = vld [vmem:[%s5110_s3 + $0x8b0] sm:$0xff] }
 0x1e7   :  { %1773 = vmatpush1.msra.mxu1 %v2795_v4  ;;  %v2811_v4 = vld [vmem:[%s5110_s3 + $0x8a0] sm:$0xff] }
 0x1e8   :  { %1470 = vmatmul.mubr.f32.gmra.mxu1 %v1311_v47  ;;  %1774 = vmatprep.subr.mxu1 %v2794_v61  ;;  %v2810_v61 = vld [vmem:[%s5110_s3 + $0x898] sm:$0xff]  ;;  %v2808_v47 = vld [vmem:[%s5110_s3 + $0x888] sm:$0xff] }
 0x1e9   :  { %1775 = vmatpush1.msra.mxu1 %v2793_v7  ;;  %2835 = vmatprep.mubr.msk.f32.mxu1 %vm1099_vm5, %v3902_v15  ;;  %v2786_v15 = vld [vmem:[%s5110_s3 + $0x7d8] sm:$0xff]  ;;  %v2809_v7 = vld [vmem:[%s5110_s3 + $0x890] sm:$0xff] }
 0x1ea   :  { %1776 = vmatprep.subr.mxu1 %v2792_v33  ;;  %v2807_v33 = vld [vmem:[%s5110_s3 + $0x880] sm:$0xff] }
 0x1eb   :  { %1777 = vmatpush1.msra.mxu1 %v2791_v21  ;;  %v1692_v21 = vmax.f32 %v1688_v37, 0.0  ;;  %v1960_v37 = vld [vmem:[%s5112_s5 + $0x60] sm:$0xff] }
 0x1ec   :  { %1778 = vmatprep.subr.mxu1 %v2790_v63  ;;  %v1691_v63 = vmax.f32 %v1687_v27, 0.0  ;;  %v1959_v27 = vld [vmem:[%s5112_s5 + $0x58] sm:$0xff] }
 0x1ed   :  { %1779 = vmatpush1.msra.mxu1 %v2789_v11  ;;  %v1694_v11 = vmax.f32 %v1690_v46, 0.0  ;;  %v2848_v46 = vld [vmem:[%s5112_s5 + $0xe8] sm:$0xff] }
 0x1ee   :  { %1780 = vmatprep.subr.mxu1 %v2788_v20  ;;  %v2847_v20 = vld [vmem:[%s5112_s5 + $0xe0] sm:$0xff] }
 0x1ef   :  { %1781 = vmatpush1.msra.mxu1 %v2787_v12  ;;  %v1956_v12 = vld [vmem:[%s5112_s5 + $0x40] sm:$0xff] }
 0x1f0   :  { %1782 = vmatprep.subr.mxu1 %v2786_v15  ;;  %v2846_v15 = vld [vmem:[%s5112_s5 + $0xd8] sm:$0xff] }
 0x1f1   :  { %1783 = vmatpush1.msra.mxu1 %v2785_v13  ;;  %v1955_v13 = vld [vmem:[%s5112_s5 + $0x38] sm:$0xff] }
 0x1f2   :  { %1784 = vmatprep.subr.mxu1 %v2784_v39 }
 0x1f3   :  { %1785 = vmatpush1.msra.mxu1 %v2783_v10 }
 0x1f4   :  { %1786 = vmatprep.subr.mxu1 %v2782_v1 }
 0x1f5   :  { %1787 = vmatpush1.msra.mxu1 %v2781_v36 }
 0x1f6   :  { %1788 = vmatprep.subr.mxu1 %v2780_v26 }
 0x1f7   :  { %1789 = vmatpush1.msra.mxu1 %v2779_v41 }
 0x1f8   :  { %1790 = vmatprep.subr.mxu1 %v2778_v53 }
 0x1f9   :  { %1791 = vmatpush1.msra.mxu1 %v2777_v51 }
 0x1fa   :  { %1792 = vmatprep.subr.mxu1 %v2776_v55 }
 0x1fb   :  { %1793 = vmatpush1.msra.mxu1 %v2775_v19 }
 0x1fc   :  { %1798 = vmatprep.subr.mxu1 %v2834_v5 }
 0x1fd   :  { %1799 = vmatpush2.msra.mxu1 %v2833_v28 }
 0x1fe   :  { %1800 = vmatprep.subr.mxu1 %v2832_v29 }
 0x1ff   :  { %1801 = vmatpush2.msra.mxu1 %v2831_v40 }
 0x200   :  { %1802 = vmatprep.subr.mxu1 %v2830_v57 }
 0x201   :  { %1803 = vmatpush2.msra.mxu1 %v2829_v32 }
 0x202   :  { %1804 = vmatprep.subr.mxu1 %v2828_v62 }
 0x203   :  { %1805 = vmatpush2.msra.mxu1 %v2827_v49 }
 0x204   :  { %1806 = vmatprep.subr.mxu1 %v2826_v45 }
 0x205   :  { %1807 = vmatpush2.msra.mxu1 %v2825_v23 }
 0x206   :  { %1808 = vmatprep.subr.mxu1 %v2824_v3 }
 0x207   :  { %1809 = vmatpush2.msra.mxu1 %v2823_v25 }
 0x208   :  { %1810 = vmatprep.subr.mxu1 %v2822_v30 }
 0x209   :  { %1811 = vmatpush2.msra.mxu1 %v2821_v31 }
 0x20a   :  { %1812 = vmatprep.subr.mxu1 %v2820_v52 }
 0x20b   :  { %1813 = vmatpush2.msra.mxu1 %v2819_v16 }
 0x20c   :  { %1814 = vmatprep.subr.mxu1 %v2818_v54 }
 0x20d   :  { %1815 = vmatpush2.msra.mxu1 %v2817_v42 }
 0x20e   :  { %1816 = vmatprep.subr.mxu1 %v2816_v8 }
 0x20f   :  { %1817 = vmatpush2.msra.mxu1 %v2815_v38 }
 0x210   :  { %1818 = vmatprep.subr.mxu1 %v2814_v58 }
 0x211   :  { %1819 = vmatpush2.msra.mxu1 %v2813_v56 }
 0x212   :  { %1820 = vmatprep.subr.mxu1 %v2812_v43 }
 0x213   :  { %1821 = vmatpush2.msra.mxu1 %v2811_v4  ;;  %v1859_v4 = vld [vmem:[%s5111_s4] sm:$0x3] }
 0x214   :  { %1822 = vmatprep.subr.mxu1 %v2810_v61 }
 0x215   :  { %1823 = vmatpush2.msra.mxu1 %v2809_v7 }
 0x216   :  { %1824 = vmatprep.subr.mxu1 %v2808_v47 }
 0x217   :  { %1825 = vmatpush2.msra.mxu1 %v2807_v33  ;;  %v4725_v33 = vrot.slane %v1859_v4, %v778_v2 }
 0x218   :  { %1827 = vmatmul.mubr.f32.vlgmr.msra.gmra.mxu1 %v3925_v24  ;;  %2081 = vmatprep.subr.mxu1 %v2985_v6  ;;  %v2853_v24 = vld [vmem:[%s5112_s5 + $0x110] sm:$0xff] }
 0x219   :  { %2836 = vmatprep.mubr.msk.f32.mxu1 %vm1099_vm5, %v1692_v21  ;;  %2082 = vmatpush1.msra.mxu1 %v1963_v50  ;;  %v1954_v50 = vld [vmem:[%s5112_s5 + $0x30] sm:$0xff] }
 0x21a   :  { %2083 = vmatprep.subr.mxu1 %v2985_v6  ;;  %2007 = vmatpush1.msra.mxu0 %v2853_v24  ;;  %v2844_v24 = vld [vmem:[%s5112_s5 + $0xc8] sm:$0xff] }
 0x21b   :  { %2084 = vmatpush1.msra.mxu1 %v1962_v48  ;;  %2008 = vmatprep.subr.mxu0 %v2985_v6 }
 0x21c   :  { %1833 = vmatmul.mubr.f32.gmra.mxu1 %v1691_v63  ;;  %2085 = vmatprep.subr.mxu1 %v2985_v6 }
 0x21d   :  { %2837 = vmatprep.mubr.msk.f32.mxu1 %vm1099_vm5, %v3993_v14  ;;  %v1961_v14 = vld [vmem:[%s5112_s5 + $0x68] sm:$0xff]  ;;  %2009 = vmatpush1.msra.mxu0 %v2852_v60 }
 0x21e   :  { %2086 = vmatpush1.msra.mxu1 %v1961_v14  ;;  %2010 = vmatprep.subr.mxu0 %v2985_v6  ;;  %v1953_v14 = vld [vmem:[%s5112_s5 + $0x28] sm:$0xff] }
 0x21f   :  { %2087 = vmatprep.subr.mxu1 %v2985_v6 }
 0x220   :  { %1839 = vmatmul.mubr.f32.gmra.mxu1 %v4017_v22  ;;  %v2851_v22 = vld [vmem:[%s5112_s5 + $0x100] sm:$0xff] }
 0x221   :  { %2838 = vmatprep.mubr.msk.f32.mxu1 %vm1099_vm5, %v1694_v11  ;;  %2011 = vmatpush1.msra.mxu0 %v2851_v22 }
 0x222   :  { %2088 = vmatpush1.msra.mxu1 %v1960_v37  ;;  %2012 = vmatprep.subr.mxu0 %v2985_v6 }
 0x223   :  { %2089 = vmatprep.subr.mxu1 %v2985_v6  ;;  %2013 = vmatpush1.msra.mxu0 %v2850_v9 }
 0x224   :  { %1845 = vmatmul.mubr.f32.gmra.mxu1 %v1693_v35  ;;  %2014 = vmatprep.subr.mxu0 %v2985_v6 }
 0x225   :  { %2090 = vmatpush1.msra.mxu1 %v1959_v27  ;;  %2015 = vmatpush1.msra.mxu0 %v2849_v17  ;;  %v2843_v27 = vld [vmem:[%s5112_s5 + $0xc0] sm:$0xff] }
 0x226   :  { %2091 = vmatprep.subr.mxu1 %v2985_v6  ;;  %2016 = vmatprep.subr.mxu0 %v2985_v6 }
 0x227   :  { %2092 = vmatpush1.msra.mxu1 %v1958_v0  ;;  %2017 = vmatpush1.msra.mxu0 %v2848_v46  ;;  %v4751_v0 = vrot.slane %v1859_v4, %v774_v18  ;;  %v2858_v4 = vld [vmem:[%s5112_s5 + $0x138] sm:$0xff] }
 0x228   :  { %2093 = vmatprep.subr.mxu1 %v2985_v6  ;;  %2018 = vmatprep.subr.mxu0 %v2985_v6 }
 0x229   :  { %2094 = vmatpush1.msra.mxu1 %v1957_v34  ;;  %2019 = vmatpush1.msra.mxu0 %v2847_v20  ;;  %v1952_v34 = vld [vmem:[%s5112_s5 + $0x20] sm:$0xff] }
 0x22a   :  { %2095 = vmatprep.subr.mxu1 %v2985_v6  ;;  %2020 = vmatprep.subr.mxu0 %v2985_v6 }
 0x22b   :  { %2096 = vmatpush1.msra.mxu1 %v1956_v12  ;;  %2021 = vmatpush1.msra.mxu0 %v2846_v15 }
 0x22c   :  { %2097 = vmatprep.subr.mxu1 %v2985_v6  ;;  %2022 = vmatprep.subr.mxu0 %v2985_v6 }
 0x22d   :  { %2098 = vmatpush1.msra.mxu1 %v1955_v13  ;;  %2023 = vmatpush1.msra.mxu0 %v2845_v44  ;;  %v1964_v44 = vld [vmem:[%s5112_s5 + $0x80] sm:$0xff] }
 0x22e   :  { %2099 = vmatprep.subr.mxu1 %v2985_v6  ;;  %2024 = vmatprep.subr.mxu0 %v2985_v6 }
 0x22f   :  { %2100 = vmatpush1.msra.mxu1 %v1954_v50  ;;  %2025 = vmatpush1.msra.mxu0 %v2844_v24 }
 0x230   :  { %2101 = vmatprep.subr.mxu1 %v2985_v6  ;;  %2026 = vmatprep.subr.mxu0 %v2985_v6 }
 0x231   :  { %2102 = vmatpush1.msra.mxu1 %v1953_v14  ;;  %2027 = vmatpush1.msra.mxu0 %v2843_v27 }
 0x232   :  { %2103 = vmatprep.subr.mxu1 %v2985_v6  ;;  %2028 = vmatprep.subr.mxu0 %v2985_v6 }
 0x233   :  { %2104 = vmatpush1.msra.mxu1 %v1952_v34  ;;  %2029 = vmatpush1.msra.mxu0 %v2842_v59 }
 0x234   :  { %2105 = vmatprep.subr.mxu1 %v2985_v6  ;;  %2030 = vmatprep.subr.mxu0 %v2985_v6 }
 0x254   :  { %v1271_v36 = vpop.f32.mrf.mxu0 }
 0x256   :  { %v1273_v53 = vpop.f32.mrf.mxu0 }
 0x257   :  { %v1174_v39 = vpop.f32.mrf.mxu1 }
 0x258   :  { %v1272_v58 = vadd.f32 %v1271_v36, %v1174_v39  ;;  %v1951_v36 = vld [vmem:[%s5112_s5 + $0x18] sm:$0xff] }
 0x259   :  { %v1176_v10 = vpop.f32.mrf.mxu1  ;;  %v1277_v55 = vpop.f32.mrf.mxu0  ;;  %2106 = vmatpush1.msra.mxu1 %v1951_v36 }
 0x25a   :  { %v1274_v54 = vadd.f32 %v1273_v53, %v1176_v10  ;;  %2107 = vmatprep.subr.mxu1 %v2985_v6 }
 0x25b   :  { %v1279_v5 = vpop.f32.mrf.mxu0 }
 0x25d   :  { %v4708_v1 = vpop.f32.mrf.mxu1 }
 0x25e   :  { %v1278_v18 = vadd.f32 %v1277_v55, %v4708_v1 }
 0x25f   :  { %v4710_v26 = vpop.f32.mrf.mxu1  ;;  %v1283_v29 = vpop.f32.mrf.mxu0 }
 0x260   :  { %v1280_v13 = vadd.f32 %v1279_v5, %v4710_v26 }
 0x261   :  { %v1285_v57 = vpop.f32.mrf.mxu0 }
 0x264   :  { %v1289_v62 = vpop.f32.mrf.mxu0 }
 0x266   :  { %v1186_v41 = vpop.f32.mrf.mxu1  ;;  %v1291_v45 = vpop.f32.mrf.mxu0 }
 0x267   :  { %v1284_v61 = vadd.f32 %v1283_v29, %v1186_v41 }
 0x268   :  { %v1188_v51 = vpop.f32.mrf.mxu1 }
 0x269   :  { %v1286_v63 = vadd.f32 %v1285_v57, %v1188_v51 }
 0x26b   :  { %v1192_v19 = vpop.f32.mrf.mxu1 }
 0x26c   :  { %v1290_v48 = vadd.f32 %v1289_v62, %v1192_v19 }
 0x26d   :  { %v1194_v28 = vpop.f32.mrf.mxu1 }
 0x26e   :  { %v1292_v20 = vadd.f32 %v1291_v45, %v1194_v28 }
 0x297   :  { %v1644_v3 = vpop.f32.mrf.mxu0 }
 0x299   :  { %v1453_v40 = vpop.f32.mrf.mxu1  ;;  %v1646_v30 = vpop.f32.mrf.mxu0 }
 0x29a   :  { %v1476_v7 = vadd.f32 %v1453_v40, %v1272_v58 }
 0x29b   :  { %v1455_v32 = vpop.f32.mrf.mxu1  ;;  %v4716_v52 = vpop.f32.mrf.mxu0 }
 0x29c   :  { %v1477_v8 = vadd.f32 %v1455_v32, %v1274_v54  ;;  %v1667_v37 = vadd.f32 %v1644_v3, %v1476_v7  ;;  %v1950_v3 = vld [vmem:[%s5112_s5 + $0x10] sm:$0xff] }
 0x29d   :  { %v4718_v42 = vpop.f32.mrf.mxu0  ;;  %2108 = vmatpush1.msra.mxu1 %v1950_v3 }
 0x29e   :  { %v4712_v49 = vpop.f32.mrf.mxu1  ;;  %v1668_v47 = vadd.f32 %v1646_v30, %v1477_v8  ;;  %2109 = vmatprep.subr.mxu1 %v2985_v6 }
 0x29f   :  { %v1656_v56 = vpop.f32.mrf.mxu0  ;;  %v1478_v19 = vadd.f32 %v4712_v49, %v1278_v18 }
 0x2a0   :  { %v4714_v23 = vpop.f32.mrf.mxu1 }
 0x2a1   :  { %v1658_v60 = vpop.f32.mrf.mxu0  ;;  %v1479_v1 = vadd.f32 %v4714_v23, %v1280_v13  ;;  %v2841_v23 = vld [vmem:[%s5112_s5 + $0xb0] sm:$0xff] }
 0x2a2   :  { %2031 = vmatpush1.msra.mxu0 %v2841_v23 }
 0x2a3   :  { %v1465_v25 = vpop.f32.mrf.mxu1  ;;  %v1670_v54 = vadd.f32 %v4718_v42, %v1479_v1  ;;  %2032 = vmatprep.subr.mxu0 %v2985_v6  ;;  %v2839_v42 = vld [vmem:[%s5112_s5 + $0xa0] sm:$0xff] }
 0x2a4   :  { %v1480_v11 = vadd.f32 %v1465_v25, %v1284_v61  ;;  %v1662_v39 = vpop.f32.mrf.mxu0  ;;  %v1669_v25 = vadd.f32 %v4716_v52, %v1478_v19  ;;  %v1967_v61 = vld [vmem:[%s5112_s5 + $0x98] sm:$0xff] }
 0x2a5   :  { %v1467_v31 = vpop.f32.mrf.mxu1 }
 0x2a6   :  { %v1481_v22 = vadd.f32 %v1467_v31, %v1286_v63  ;;  %v1671_v15 = vadd.f32 %v1656_v56, %v1480_v11  ;;  %v1664_v40 = vpop.f32.mrf.mxu0  ;;  %v2840_v31 = vld [vmem:[%s5112_s5 + $0xa8] sm:$0xff]  ;;  %v1966_v63 = vld [vmem:[%s5112_s5 + $0x90] sm:$0xff] }
 0x2a7   :  { %2033 = vmatpush1.msra.mxu0 %v2840_v31  ;;  %v1965_v11 = vld [vmem:[%s5112_s5 + $0x88] sm:$0xff] }
 0x2a8   :  { %v1471_v16 = vpop.f32.mrf.mxu1  ;;  %v1672_v51 = vadd.f32 %v1658_v60, %v1481_v22  ;;  %2034 = vmatprep.subr.mxu0 %v2985_v6 }
 0x2a9   :  { %v1482_v17 = vadd.f32 %v1471_v16, %v1290_v48  ;;  %v1949_v16 = vld [vmem:[%s5112_s5 + $0x8] sm:$0xff]  ;;  %2035 = vmatpush1.msra.mxu0 %v2839_v42 }
 0x2aa   :  { %v1473_v38 = vpop.f32.mrf.mxu1  ;;  %2110 = vmatpush1.msra.mxu1 %v1949_v16  ;;  %2060 = vmatprep.subr.mxu0 %v2985_v6  ;;  %v2895_v42 = vld [vmem:[%s5112_s5 + $0x248] sm:$0xff] }
 0x2ab   :  { %v1483_v41 = vadd.f32 %v1473_v38, %v1292_v20  ;;  %v1673_v55 = vadd.f32 %v1662_v39, %v1482_v17  ;;  %2111 = vmatprep.subr.mxu1 %v2985_v6  ;;  %2061 = vmatpush2.msra.mxu0 %v2858_v4 }
 0x2ac   :  { %2062 = vmatprep.subr.mxu0 %v2985_v6 }
 0x2ad   :  { %v1674_v49 = vadd.f32 %v1664_v40, %v1483_v41 }
 0x2d8   :  { %v1828_v43 = vpop.f32.mrf.mxu1 }
 0x2d9   :  { %v1851_v12 = vadd.f32 %v1828_v43, %v1667_v37  ;;  %v1948_v43 = vld [vmem:[%s5112_s5] sm:$0xff] }
 0x2da   :  { %v1830_v21 = vpop.f32.mrf.mxu1  ;;  %2112 = vmatpush1.msra.mxu1 %v1948_v43 }
 0x2db   :  { %v1852_v35 = vadd.f32 %v1830_v21, %v1668_v47  ;;  %v4773_v5 = vadd.f32 %v4751_v0, %v1851_v12  ;;  %2137 = vmatprep.subr.mxu1 %v2985_v6  ;;  %v2857_v21 = vld [vmem:[%s5112_s5 + $0x130] sm:$0xff] }
 0x2dc   :  { %v4736_v2 = vpop.f32.mrf.mxu1  ;;  %2138 = vmatpush2.msra.mxu1 %v1967_v61  ;;  %2063 = vmatpush2.msra.mxu0 %v2857_v21  ;;  %v2874_v61 = vld [vmem:[%s5112_s5 + $0x1a8] sm:$0xff] }
 0x2dd   :  { %v4742_v9 = vadd.f32 %v4725_v33, %v1852_v35  ;;  %v1853_v52 = vadd.f32 %v4736_v2, %v1669_v25  ;;  %2139 = vmatprep.subr.mxu1 %v2985_v6  ;;  %2064 = vmatprep.subr.mxu0 %v2985_v6  ;;  %v2855_v35 = vld [vmem:[%s5112_s5 + $0x120] sm:$0xff]  ;;  %v2897_v25 = vld [vmem:[%s5112_s5 + $0x258] sm:$0xff] }
 0x2de   :  { %v1836_v46 = vpop.f32.mrf.mxu1  ;;  %2140 = vmatpush2.msra.mxu1 %v1966_v63 }
 0x2df   :  { %1889 = vrot.lane.b32.xlu0 %v4742_v9, %s2986_s13  ;;  %v1854_v38 = vadd.f32 %v1836_v46, %v1670_v54  ;;  %v4830_v7 = vadd.f32 %v4751_v0, %v1853_v52  ;;  %2141 = vmatprep.subr.mxu1 %v2985_v6  ;;  %v2876_v54 = vld [vmem:[%s5112_s5 + $0x1b8] sm:$0xff] }
 0x2e0   :  { %v1840_v10 = vpop.f32.mrf.mxu1  ;;  %2142 = vmatpush2.msra.mxu1 %v1965_v11  ;;  %v2873_v11 = vld [vmem:[%s5112_s5 + $0x1a0] sm:$0xff] }
 0x2e1   :  { %v1855_v53 = vadd.f32 %v1840_v10, %v1671_v15  ;;  %v4833_v47 = vadd.f32 %v4725_v33, %v1854_v38  ;;  %2143 = vmatprep.subr.mxu1 %v2985_v6 }
 0x2e2   :  { %v1842_v26 = vpop.f32.mrf.mxu1  ;;  %2144 = vmatpush2.msra.mxu1 %v1964_v44  ;;  %v2872_v44 = vld [vmem:[%s5112_s5 + $0x198] sm:$0xff] }
 0x2e3   :  { %v4776_v28 = vadd.f32 %v4751_v0, %v1855_v53  ;;  %v1856_v29 = vadd.f32 %v1842_v26, %v1672_v51  ;;  %2304 = vmatprep.subr.mxu1 %v2985_v6 }
 0x2e4   :  { %v1846_v57 = vpop.f32.mrf.mxu1 }
 0x2e5   :  { %v4781_v32 = vadd.f32 %v4725_v33, %v1856_v29  ;;  %v1857_v62 = vadd.f32 %v1846_v57, %v1673_v55  ;;  %v2954_v45 = vpack.i.bf16 %v4776_v28, %v4773_v5 }
 0x2e6   :  { %v1848_v30 = vpop.f32.mrf.mxu1 }
 0x2e7   :  { %v1858_v8 = vadd.f32 %v1848_v30, %v1674_v49  ;;  %2955 = vrot.lane.b32.xlu0 %v2954_v45, %s2986_s13  ;;  %1897 = vrot.lane.b32.xlu1 %v4781_v32, %s2986_s13  ;;  %v4806_v58 = vadd.f32 %v4751_v0, %v1857_v62 }
 0x2e9   :  { %v4809_v56 = vadd.f32 %v4725_v33, %v1858_v8  ;;  %v2856_v33 = vld [vmem:[%s5112_s5 + $0x128] sm:$0xff]  ;;  %v2896_v8 = vld [vmem:[%s5112_s5 + $0x250] sm:$0xff] }
 0x2ea   :  { %2065 = vmatpush2.msra.mxu0 %v2856_v33  ;;  %v2894_v33 = vld [vmem:[%s5112_s5 + $0x240] sm:$0xff] }
 0x2eb   :  { %1899 = vrot.lane.b32.xlu0 %v4806_v58, %s2986_s13  ;;  %1901 = vrot.lane.b32.xlu1 %v4809_v56, %s2986_s13 }
 0x2ec   :  { %2066 = vmatprep.subr.mxu0 %v2985_v6 }
 0x2ed   :  { %2067 = vmatpush2.msra.mxu0 %v2855_v35 }
 0x2ee   :  { %2203 = vmatprep.subr.mxu0 %v2985_v6 }
 0x2ef   :  { %1891 = vrot.lane.b32.xlu0 %v4830_v7, %s2986_s13  ;;  %1893 = vrot.lane.b32.xlu1 %v4833_v47, %s2986_s13 }
 0x351   :  { %v1890_v50 = vpop.permute.xlu0 %1889 }
 0x352   :  { %v1916_v24 = vsel %vm1915_vm8, %v1890_v50, %v4742_v9 }
 0x353   :  { %v1921_v48 = vmax.f32 %v4742_v9, %v1916_v24 }
 0x355   :  { %v1933_v60 = vrot.slane %v1921_v48, 2 }
 0x357   :  { %v1941_v22 = vmax.f32 %v1921_v48, %v1933_v60  ;;  %v2871_v48 = vld [vmem:[%s5112_s5 + $0x190] sm:$0xff] }
 0x358   :  { %v2892_v60 = vld [vmem:[%s5112_s5 + $0x230] sm:$0xff] }
 0x359   :  { %v2956_v2 = vpop.permute.xlu0 %2955  ;;  %v1898_v14 = vpop.permute.xlu1 %1897  ;;  %v1945_v59 = vmax.f32 %v1941_v22, 0.0  ;;  %v2869_v22 = vld [vmem:[%s5112_s5 + $0x180] sm:$0xff] }
 0x35a   :  { %v2958_v37 = vunpack.i.h.bf16 %v2956_v2  ;;  %v2957_v27 = vunpack.i.l.bf16 %v2956_v2  ;;  %v1918_v17 = vsel %vm1915_vm8, %v1898_v14, %v4781_v32  ;;  %v2870_v2 = vld [vmem:[%s5112_s5 + $0x188] sm:$0xff] }
 0x35b   :  { %v1925_v0 = vmax.f32 %v4781_v32, %v1918_v17  ;;  %v1997_v1 = vrot.slane %v1945_v59, 4  ;;  %v2868_v17 = vld [vmem:[%s5112_s5 + $0x178] sm:$0xff] }
 0x35c   :  { %v1903_v46 = vsel %vm830_vm4, %v2957_v27, %v1890_v50  ;;  %v1905_v34 = vsel %vm830_vm4, %v2958_v37, %v1898_v14  ;;  %v2893_v50 = vld [vmem:[%s5112_s5 + $0x238] sm:$0xff]  ;;  %v2891_v14 = vld [vmem:[%s5112_s5 + $0x228] sm:$0xff]  ;;  %v2890_v37 = vld [vmem:[%s5112_s5 + $0x220] sm:$0xff] }
 0x35d   :  { %v1920_v20 = vmax.f32 %v4773_v5, %v1903_v46  ;;  %v1924_v12 = vmax.f32 %v4776_v28, %v1905_v34  ;;  %v1935_v9 = vrot.slane %v1925_v0, 2  ;;  %v4877_v15 = vpop.permute.xlu1 %1901  ;;  %v1900_v24 = vpop.permute.xlu0 %1899  ;;  %v2867_v34 = vld [vmem:[%s5112_s5 + $0x170] sm:$0xff] }
 0x35e   :  { %v1919_v18 = vsel %vm1915_vm8, %v4877_v15, %v4809_v56 }
 0x35f   :  { %v1932_v13 = vrot.slane %v1920_v20, 2  ;;  %v1934_v39 = vrot.slane %v1924_v12, 2  ;;  %v1943_v10 = vmax.f32 %v1925_v0, %v1935_v9  ;;  %v1927_v36 = vmax.f32 %v4809_v56, %v1919_v18  ;;  %v2875_v56 = vld [vmem:[%s5112_s5 + $0x1b0] sm:$0xff]  ;;  %v2889_v0 = vld [vmem:[%s5112_s5 + $0x218] sm:$0xff]  ;;  %v2866_v9 = vld [vmem:[%s5112_s5 + $0x168] sm:$0xff] }
 0x361   :  { %v1940_v41 = vmax.f32 %v1920_v20, %v1932_v13  ;;  %v1942_v53 = vmax.f32 %v1924_v12, %v1934_v39  ;;  %v1947_v51 = vmax.f32 %v1943_v10, 0.0  ;;  %v4883_v19 = vpop.permute.xlu1 %1893  ;;  %v2158_v26 = vrot.slane %v1927_v36, 2  ;;  %v1892_v27 = vpop.permute.xlu0 %1891  ;;  %v2888_v20 = vld [vmem:[%s5112_s5 + $0x210] sm:$0xff]  ;;  %v2886_v13 = vld [vmem:[%s5112_s5 + $0x200] sm:$0xff]  ;;  %v2885_v10 = vld [vmem:[%s5112_s5 + $0x1f8] sm:$0xff] }
 0x362   :  { %v1917_v55 = vsel %vm1915_vm8, %v4883_v19, %v4833_v47  ;;  %v1904_v46 = vsel %vm830_vm4, %v1892_v27, %v4883_v19  ;;  %v1906_v12 = vsel %vm830_vm4, %v1900_v24, %v4877_v15  ;;  %v2865_v15 = vld [vmem:[%s5112_s5 + $0x160] sm:$0xff]  ;;  %v2883_v19 = vld [vmem:[%s5112_s5 + $0x1e8] sm:$0xff] }
 0x363   :  { %v1944_v5 = vmax.f32 %v1940_v41, 0.0  ;;  %v1946_v28 = vmax.f32 %v1942_v53, 0.0  ;;  %v1998_v29 = vrot.slane %v1947_v51, 3  ;;  %v2076_v40 = vrot.slane %v1947_v51, 7  ;;  %v2884_v41 = vld [vmem:[%s5112_s5 + $0x1f0] sm:$0xff]  ;;  %v2862_v51 = vld [vmem:[%s5112_s5 + $0x148] sm:$0xff] }
 0x364   :  { %v2166_v57 = vmax.f32 %v1927_v36, %v2158_v26  ;;  %v1923_v32 = vmax.f32 %v4833_v47, %v1917_v55  ;;  %v1922_v18 = vmax.f32 %v4830_v7, %v1904_v46  ;;  %v1926_v39 = vmax.f32 %v4806_v58, %v1906_v12  ;;  %v2864_v7 = vld [vmem:[%s5112_s5 + $0x158] sm:$0xff]  ;;  %v2863_v58 = vld [vmem:[%s5112_s5 + $0x150] sm:$0xff]  ;;  %v2861_v26 = vld [vmem:[%s5112_s5 + $0x140] sm:$0xff] }
 0x365   :  { %v1994_v62 = vrot.slane %v1946_v28, 3  ;;  %v2074_v49 = vrot.slane %v1946_v28, 7  ;;  %v1999_v45 = vsel %vm1995_vm9, %v1998_v29, %v1997_v1  ;;  %v2077_v23 = vsel %vm1995_vm9, %v2076_v40, %v1945_v59  ;;  %v2887_v59 = vld [vmem:[%s5112_s5 + $0x208] sm:$0xff]  ;;  %v2882_v55 = vld [vmem:[%s5112_s5 + $0x1e0] sm:$0xff]  ;;  %v2880_v28 = vld [vmem:[%s5112_s5 + $0x1d8] sm:$0xff] }
 0x366   :  { %v2156_v3 = vrot.slane %v1923_v32, 2  ;;  %2859 = vmatprep.mubr.msk.f32.mxu0 %vm2001_vm10, %v1999_v45  ;;  %2860 = vmatprep.mubr.msk.f32.mxu1 %vm2001_vm10, %v2077_v23  ;;  %v2170_v30 = vmax.f32 %v2166_v57, 0.0  ;;  %v1993_v31 = vrot.slane %v1944_v5, 4  ;;  %v2155_v36 = vrot.slane %v1922_v18, 2  ;;  %v2901_v29 = vld [vmem:[%s5112_s5 + $0x278] sm:$0xff]  ;;  %v2879_v57 = vld [vmem:[%s5112_s5 + $0x1d0] sm:$0xff] }
 0x367   :  { %v2075_v16 = vsel %vm1995_vm9, %v2074_v49, %v1944_v5  ;;  %v2157_v53 = vrot.slane %v1926_v39, 2  ;;  %v2878_v49 = vld [vmem:[%s5112_s5 + $0x1c8] sm:$0xff] }
 0x368   :  { %2146 = vmatmul.mubr.f32.vlgmr.msra.gmra.mxu1 %v2075_v16  ;;  %v2164_v52 = vmax.f32 %v1923_v32, %v2156_v3  ;;  %v1996_v38 = vsel %vm1995_vm9, %v1994_v62, %v1993_v31  ;;  %v2198_v43 = vrot.slane %v2170_v30, 7  ;;  %v2299_v47 = vrot.slane %v2170_v30, 3  ;;  %v2900_v32 = vld [vmem:[%s5112_s5 + $0x270] sm:$0xff]  ;;  %v2899_v45 = vld [vmem:[%s5112_s5 + $0x268] sm:$0xff]  ;;  %v2877_v3 = vld [vmem:[%s5112_s5 + $0x1c0] sm:$0xff] }
 0x369   :  { %2305 = vmatpush1.msra.mxu1 %v2897_v25  ;;  %2069 = vmatmul.mubr.f32.vlgmr.msra.gmra.mxu0 %v1996_v38  ;;  %v2163_v1 = vmax.f32 %v1922_v18, %v2155_v36  ;;  %v2165_v5 = vmax.f32 %v1926_v39, %v2157_v53  ;;  %v2898_v25 = vld [vmem:[%s5112_s5 + $0x260] sm:$0xff] }
 0x36a   :  { %2306 = vmatprep.subr.mxu1 %v2985_v6  ;;  %v2168_v4 = vmax.f32 %v2164_v52, 0.0  ;;  %2204 = vmatpush1.msra.mxu0 %v2876_v54  ;;  %v2389_v52 = vld [vmem:[%s5114_s7 + $0x28] sm:$0xff]  ;;  %v2388_v38 = vld [vmem:[%s5114_s7 + $0x20] sm:$0xff] }
 0x36b   :  { %2307 = vmatpush1.msra.mxu1 %v2896_v8  ;;  %2205 = vmatprep.subr.mxu0 %v2985_v6  ;;  %v2167_v40 = vmax.f32 %v2163_v1, 0.0  ;;  %v2169_v62 = vmax.f32 %v2165_v5, 0.0  ;;  %v2390_v8 = vld [vmem:[%s5114_s7 + $0x30] sm:$0x3] }
 0x36c   :  { %2308 = vmatprep.subr.mxu1 %v2985_v6  ;;  %v2298_v21 = vrot.slane %v2168_v4, 4  ;;  %2206 = vmatpush1.msra.mxu0 %v2875_v56  ;;  %v2199_v63 = vsel %vm1995_vm9, %v2198_v43, %v2168_v4  ;;  %v2387_v56 = vld [vmem:[%s5114_s7 + $0x18] sm:$0xff]  ;;  %v2385_v43 = vld [vmem:[%s5114_s7 + $0x8] sm:$0xff]  ;;  %v2384_v4 = vld [vmem:[%s5114_s7] sm:$0xff] }
 0x36d   :  { %2309 = vmatpush1.msra.mxu1 %v2895_v42  ;;  %2207 = vmatprep.subr.mxu0 %v2985_v6  ;;  %v2295_v23 = vrot.slane %v2167_v40, 4  ;;  %v2196_v30 = vrot.slane %v2169_v62, 7  ;;  %v2296_v31 = vrot.slane %v2169_v62, 3  ;;  %v2386_v42 = vld [vmem:[%s5114_s7 + $0x10] sm:$0xff] }
 0x36e   :  { %2881 = vmatprep.mubr.msk.f32.mxu0 %vm2001_vm10, %v2199_v63  ;;  %2208 = vmatpush1.msra.mxu0 %v2874_v61  ;;  %v2300_v35 = vsel %vm1995_vm9, %v2299_v47, %v2298_v21 }
 0x36f   :  { %2310 = vmatprep.subr.mxu1 %v2985_v6  ;;  %2209 = vmatprep.subr.mxu0 %v2985_v6  ;;  %v2197_v16 = vsel %vm1995_vm9, %v2196_v30, %v2167_v40  ;;  %v2297_v54 = vsel %vm1995_vm9, %v2296_v31, %v2295_v23 }
 0x370   :  { %2311 = vmatpush1.msra.mxu1 %v2894_v33  ;;  %2210 = vmatpush1.msra.mxu0 %v2873_v11 }
 0x371   :  { %2902 = vmatprep.mubr.msk.f32.mxu1 %vm2001_vm10, %v2300_v35  ;;  %2211 = vmatprep.subr.mxu0 %v2985_v6 }
 0x372   :  { %2312 = vmatprep.subr.mxu1 %v2985_v6  ;;  %2212 = vmatpush1.msra.mxu0 %v2872_v44 }
 0x373   :  { %2313 = vmatpush1.msra.mxu1 %v2893_v50  ;;  %2213 = vmatprep.subr.mxu0 %v2985_v6  ;;  %v2903_v50 = vld [vmem:[%s5113_s6] ss:$0 sm:$0xff]  ;;  %s2988_s6 = smov [#allocation2]  }
 0x374   :  { %2314 = vmatprep.subr.mxu1 %v2985_v6  ;;  %2214 = vmatpush1.msra.mxu0 %v2871_v48 }
 0x375   :  { %2315 = vmatpush1.msra.mxu1 %v2892_v60  ;;  %2215 = vmatprep.subr.mxu0 %v2985_v6 }
 0x376   :  { %2316 = vmatprep.subr.mxu1 %v2985_v6  ;;  %2216 = vmatpush1.msra.mxu0 %v2870_v2 }
 0x377   :  { %2317 = vmatpush1.msra.mxu1 %v2891_v14  ;;  %2217 = vmatprep.subr.mxu0 %v2985_v6 }
 0x378   :  { %2318 = vmatprep.subr.mxu1 %v2985_v6  ;;  %2218 = vmatpush1.msra.mxu0 %v2869_v22 }
 0x379   :  { %2319 = vmatpush1.msra.mxu1 %v2890_v37  ;;  %2219 = vmatprep.subr.mxu0 %v2985_v6 }
 0x37a   :  { %2320 = vmatprep.subr.mxu1 %v2985_v6  ;;  %2220 = vmatpush1.msra.mxu0 %v2868_v17 }
 0x37b   :  { %2321 = vmatpush1.msra.mxu1 %v2889_v0  ;;  %2221 = vmatprep.subr.mxu0 %v2985_v6 }
 0x37c   :  { %2322 = vmatprep.subr.mxu1 %v2985_v6  ;;  %2222 = vmatpush1.msra.mxu0 %v2867_v34 }
 0x37d   :  { %2323 = vmatpush1.msra.mxu1 %v2888_v20  ;;  %2223 = vmatprep.subr.mxu0 %v2985_v6 }
 0x37e   :  { %2324 = vmatprep.subr.mxu1 %v2985_v6  ;;  %2224 = vmatpush1.msra.mxu0 %v2866_v9 }
 0x37f   :  { %2325 = vmatpush1.msra.mxu1 %v2887_v59  ;;  %2225 = vmatprep.subr.mxu0 %v2985_v6 }
 0x380   :  { %2326 = vmatprep.subr.mxu1 %v2985_v6  ;;  %2226 = vmatpush1.msra.mxu0 %v2865_v15 }
 0x381   :  { %2327 = vmatpush1.msra.mxu1 %v2886_v13  ;;  %2227 = vmatprep.subr.mxu0 %v2985_v6 }
 0x382   :  { %2328 = vmatprep.subr.mxu1 %v2985_v6  ;;  %2228 = vmatpush1.msra.mxu0 %v2864_v7 }
 0x383   :  { %2329 = vmatpush1.msra.mxu1 %v2885_v10  ;;  %2229 = vmatprep.subr.mxu0 %v2985_v6 }
 0x384   :  { %2330 = vmatprep.subr.mxu1 %v2985_v6  ;;  %2230 = vmatpush1.msra.mxu0 %v2863_v58 }
 0x385   :  { %2331 = vmatpush1.msra.mxu1 %v2884_v41  ;;  %2231 = vmatprep.subr.mxu0 %v2985_v6 }
 0x386   :  { %2332 = vmatprep.subr.mxu1 %v2985_v6  ;;  %2232 = vmatpush1.msra.mxu0 %v2862_v51 }
 0x387   :  { %2333 = vmatpush1.msra.mxu1 %v2883_v19  ;;  %2233 = vmatprep.subr.mxu0 %v2985_v6 }
 0x388   :  { %2334 = vmatprep.subr.mxu1 %v2985_v6  ;;  %2234 = vmatpush1.msra.mxu0 %v2861_v26 }
 0x389   :  { %2335 = vmatpush1.msra.mxu1 %v2882_v55  ;;  %2259 = vmatprep.subr.mxu0 %v2985_v6 }
 0x38a   :  { %2360 = vmatprep.subr.mxu1 %v2985_v6  ;;  %2260 = vmatpush2.msra.mxu0 %v2880_v28 }
 0x38b   :  { %2361 = vmatpush2.msra.mxu1 %v2901_v29  ;;  %2261 = vmatprep.subr.mxu0 %v2985_v6 }
 0x38c   :  { %2362 = vmatprep.subr.mxu1 %v2985_v6  ;;  %2262 = vmatpush2.msra.mxu0 %v2879_v57 }
 0x38d   :  { %2363 = vmatpush2.msra.mxu1 %v2900_v32  ;;  %2263 = vmatprep.subr.mxu0 %v2985_v6 }
 0x38e   :  { %2364 = vmatprep.subr.mxu1 %v2985_v6  ;;  %2264 = vmatpush2.msra.mxu0 %v2878_v49 }
 0x38f   :  { %2365 = vmatpush2.msra.mxu1 %v2899_v45  ;;  %2265 = vmatprep.subr.mxu0 %v2985_v6 }
 0x390   :  { %2366 = vmatprep.subr.mxu1 %v2985_v6  ;;  %2266 = vmatpush2.msra.mxu0 %v2877_v3 }
 0x391   :  { %2367 = vmatpush2.msra.mxu1 %v2898_v25  ;;  %2268 = vmatmul.mubr.f32.vlgmr.msra.gmra.mxu0 %v2197_v16 }
 0x392   :  { %2369 = vmatmul.mubr.f32.vlgmr.msra.gmra.mxu1 %v2297_v54  ;;  %2915 = vmatprep.subr.mxu0 %v2985_v6 }
 0x393   :  { %2916 = vmatpush3.msk.msra.mxu0 %vm1484_vm7, %v2390_v8  ;;  %2929 = vmatprep.mubr.msk.f32.mxu0 %vm2987_vm11, %v2985_v6 }
 0x394   :  { %2917 = vmatprep.subr.mxu0 %v2985_v6 }
 0x395   :  { %2918 = vmatpush3.msra.mxu0 %v2389_v52 }
 0x396   :  { %2919 = vmatprep.subr.mxu0 %v2985_v6 }
 0x397   :  { %2920 = vmatpush3.msra.mxu0 %v2388_v38 }
 0x398   :  { %2921 = vmatprep.subr.mxu0 %v2985_v6 }
 0x399   :  { %2922 = vmatpush3.msra.mxu0 %v2387_v56 }
 0x39a   :  { %2923 = vmatprep.subr.mxu0 %v2985_v6 }
 0x39b   :  { %2924 = vmatpush3.msra.mxu0 %v2386_v42 }
 0x39c   :  { %2925 = vmatprep.subr.mxu0 %v2985_v6 }
 0x39d   :  { %2926 = vmatpush3.msra.mxu0 %v2385_v43 }
 0x39e   :  { %2927 = vmatprep.subr.mxu0 %v2985_v6  ;;  %v2904_v6 = vld [vmem:[%s5115_s8] ss:$0 sm:$0xff]  ;;  %s2495_s8 = sshll.u32 %s2988_s6, 4  ;;  %s2496_s8 = int_to_ptr.vmem [resolvable:$true] %s2495_s8 }
 0x39f   :  { %2928 = vmatpush3.msra.mxu0 %v2384_v4  ;;  %s2963_s3 = scalar_lea.vmem %s2496_s8, 32  ;;  %p2968_p1 = scmp.lt.s32.totalorder %s2496_s8, %s2496_s8 }
 0x3a0   :  { %p2964_p0 = scmp.ne.s32.totalorder %s2496_s8, %s2963_s3  ;;  %p2969_p2 = scmp.lt.s32.totalorder %s2963_s3, %s2963_s3 }
 0x3a2   :  { %p2970_p3 = por %p2969_p2, %p2968_p1 }
 0x3a4   :  { %p2971_p4 = pnand %p2970_p3, %p2964_p0 }
 0x428   :  { %v2147_v61 = vpop.f32.mrf.mxu1 }
 0x429   :  { %v2070_v47 = vpop.f32.mrf.mxu0 }
 0x42a   :  { %v2149_v21 = vpop.f32.mrf.mxu1  ;;  %v2148_v33 = vadd.f32 %v2147_v61, %v2070_v47 }
 0x42b   :  { %v2072_v63 = vpop.f32.mrf.mxu0 }
 0x451   :  { %v2269_v11 = vpop.f32.mrf.mxu0 }
 0x452   :  { %v2370_v35 = vpop.f32.mrf.mxu1  ;;  %v2273_v44 = vadd.f32 %v2269_v11, %v2148_v33 }
 0x453   :  { %v2271_v24 = vpop.f32.mrf.mxu0 }
 0x454   :  { %v2372_v48 = vpop.f32.mrf.mxu1  ;;  %v2374_v60 = vadd.f32 %v2370_v35, %v2273_v44 }
 0x456   :  { %v2382_v2 = vadd.f32 %v2903_v50, %v2374_v60 }
 0x458   :  { %v2383_v14 = vmax.f32 %v2382_v2, 0.0 }
 0x45a   :  { %2930 = vmatmul.mubr.msk.f32.vlgmr.msra.gmra.mxu0 %vm2398_vm12, %v2383_v14 }
 0x51a   :  { %v2471_v22 = vpop.f32.mrf.mxu0 }
 0x51b   :  { %v2472_v37 = vadd.f32 %v2904_v6, %v2471_v22 }
 0x51c   :  { %v2931_v27 = vpop.f32.mrf.mxu0 }
 0x51d   :  { %v2476_v17 = vsel %vm2475_vm13, %v2472_v37, -inf }
 0x51e   :  { %2477 = vmax.xlane.f32.xlu1 %v2476_v17 }
 0x5a7   :  { %v2478_v0 = vpop.xlane.xlu1 %2477 }
 0x5a8   :  { %v2479_v46 = vsub.f32 %v2472_v37, %v2478_v0 }
 0x5aa   :  { %v2480_v34 = vmul.f32 1.442695, %v2479_v46 }
 0x5ac   :  { %2959 = vpow2.f32 %v2480_v34 }
 0x5b9   :  { %v2960_v20 = vpop.eup %2959 }
 0x5ba   :  { %v2482_v12 = vsel %vm2475_vm13, %v2960_v20, 0.0 }
 0x5bb   :  { %2483 = vadd.xlane.f32.xlu0 %v2482_v12 }
 0x644   :  { %v2484_v9 = vpop.xlane.xlu0 %2483 }
 0x645   :  { %2961 = vlog2.f32 %v2484_v9 }
 0x652   :  { %v2962_v59 = vpop.eup %2961 }
 0x653   :  { %v2486_v18 = vmul.f32 0.6931472, %v2962_v59 }
 0x655   :  { %v2487_v15 = vsub.f32 %v2479_v46, %v2486_v18 }
 0x657   :  { %2488 = vst.msk [vmem:[#allocation2] sm:$0x3] %vm2475_vm13, %v2487_v15 }
 0x658   :  { %2974 = shalt.err (!%p2971_p4)
}
 0x659   :  { %2498 = dma.vmem_to_hbm [thread:$0]  %s2496_s8, 32, %s5116_s9, [#allocation3]  }
 0x65a   :  { %2983 = dma.done.wait [#allocation3], 32  }
 0x65b   :  { %2984 = vsyncadd [#allocation3], 4294967264 }
 0x65c   :  { %2502 = vsyncpa [#allocation3], 1 }

</bundles_post_ra>
